<compile_context>
chip_gen: v6e
topology: v6e:2x2x1
jax: 0.10.0
libtpu: 0.0.40
codegen_flags: <defaults>
</compile_context>

<pallas_src>
import functools

import jax
import jax.numpy as jnp
import numpy as np
from jax.experimental import pallas as pl
from jax.experimental.pallas import tpu as pltpu


def ghost_bottleneck_kernel(x_ref, m_ref, wp1_ref, bp1_ref, wd1_ref, bd1_ref,
                            wp2_ref, bp2_ref, wd2_ref, bd2_ref, o_ref, *, W):
    # x_ref : (1, C1, HW)  one image, channels on sublanes, H*W on lanes
    # m_ref : (10, HW)     f32 edge masks: rows 0..4 = col masks (dx), 5..9 = row masks (dy)
    # wp1   : (h1, C1)  bp1: (h1, 1)   GhostConv1.cv1 (1x1 conv, BN folded, SiLU)
    # wd1   : (h1, 25)  bd1: (h1, 1)   GhostConv1.cv2 (5x5 depthwise, BN folded, SiLU)
    # wp2   : (c_, c_)  bp2: (c_, 1)   GhostConv2.cv1 (1x1 conv on cat([y1;y2]), no act)
    # wd2   : (c_, 25)  bd2: (c_, 1)   GhostConv2.cv2 (5x5 depthwise, BN folded, no act)
    # o_ref : (1, C2, HW) with C2 == C1 (residual add)
    HW = x_ref.shape[2]
    x = x_ref[0]                                   # (C1, HW), lane-dense
    masks = m_ref[...]                             # (10, HW), hoisted once, shared by both DW convs

    def dw5x5(src, w_ref, b_ref):
        # 5x5 depthwise conv, stride 1, pad 2, on (C, HW): lane rolls + edge masks.
        w = w_ref[...]                             # (C, 25): all taps, single load
        b = b_ref[...]                             # (C, 1)
        # Column taps (dx): roll along lanes, mask invalid columns.  Shared across dy.
        cols = []
        for dx in range(5):
            v = src if dx == 2 else pltpu.roll(src, (2 - dx) % HW, 1)
            if dx != 2:
                v = v * masks[dx:dx + 1, :]
            cols.append(v)
        # One independent partial accumulator per dy row (ILP), then tree-sum.
        parts = []
        for dy in range(5):
            t = dy * 5
            p = cols[0] * w[:, t:t + 1]
            for dx in range(1, 5):
                p = p + cols[dx] * w[:, t + dx:t + dx + 1]
            if dy != 2:
                p = pltpu.roll(p, ((2 - dy) * W) % HW, 1)
                p = p * masks[5 + dy:6 + dy, :]
            parts.append(p)
        return ((parts[0] + parts[1]) + (parts[2] + parts[3])) + (parts[4] + b)

    # ---- GhostConv #1 (act = SiLU) ----
    y1 = jnp.dot(wp1_ref[...], x, preferred_element_type=jnp.float32) + bp1_ref[...]
    y1 = y1 * jax.nn.sigmoid(y1)                   # SiLU (EUP)
    y2 = dw5x5(y1, wd1_ref, bd1_ref)
    y2 = y2 * jax.nn.sigmoid(y2)                   # SiLU

    # ---- GhostConv #2 (act = Identity): single fused 1x1 over cat([y1; y2]) ----
    y12 = jnp.concatenate([y1, y2], axis=0)        # (c_, HW) cheap sublane concat
    z1 = jnp.dot(wp2_ref[...], y12, preferred_element_type=jnp.float32) + bp2_ref[...]
    z2 = dw5x5(z1, wd2_ref, bd2_ref)

    # ---- channel concat (sublanes) + identity shortcut, one lane-dense store ----
    o_ref[0] = (jnp.concatenate([z1, z2], axis=0) + x).astype(o_ref.dtype)


def _edge_masks(H, W):
    """(10, H*W) f32: rows 0..4 column-validity per dx, rows 5..9 row-validity per dy."""
    row = np.repeat(np.arange(H), W)
    col = np.tile(np.arange(W), H)
    m = np.empty((10, H * W), np.float32)
    for d in range(5):
        m[d] = ((col + d - 2 >= 0) & (col + d - 2 < W)).astype(np.float32)
        m[5 + d] = ((row + d - 2 >= 0) & (row + d - 2 < H)).astype(np.float32)
    return jnp.asarray(m)


@jax.jit
def ghost_bottleneck_forward(x_nchw, params):
    """x_nchw: (B, C1, H, W) float32 (PyTorch layout). Returns (B, C2, H, W)."""
    B, C1, H, W = x_nchw.shape
    h1 = params["wp1"].shape[0]
    c_ = params["wp2"].shape[0]
    C2 = 2 * c_
    assert C1 == C2, "s == 1 GhostBottleneck residual requires c1 == c2"
    HW = H * W

    # NCHW -> (B, C, H*W): free contiguous reshape, spatial lands on lanes.
    x = x_nchw.reshape(B, C1, HW)
    masks = _edge_masks(H, W)

    kernel = functools.partial(ghost_bottleneck_kernel, W=W)

    n_param = int(sum(int(np.prod(v.shape)) for v in params.values()))
    flops = 2 * B * HW * (C1 * h1 + 25 * h1 + c_ * c_ + 25 * c_)
    transcendentals = 2 * B * HW * h1                       # two SiLU layers
    bytes_accessed = 4 * (2 * B * HW * C1 + n_param + 10 * HW)

    def full(a):
        return pl.BlockSpec(a.shape, lambda b: (0,) * a.ndim)

    out = pl.pallas_call(
        kernel,
        out_shape=jax.ShapeDtypeStruct((B, C2, HW), jnp.float32),
        grid=(B,),
        in_specs=[
            pl.BlockSpec((1, C1, HW), lambda b: (b, 0, 0)),
            full(masks),
            full(params["wp1"]), full(params["bp1"]),
            full(params["wd1"]), full(params["bd1"]),
            full(params["wp2"]), full(params["bp2"]),
            full(params["wd2"]), full(params["bd2"]),
        ],
        out_specs=pl.BlockSpec((1, C2, HW), lambda b: (b, 0, 0)),
        input_output_aliases={0: 0},                        # residual: same shape, disjoint blocks
        compiler_params=pltpu.CompilerParams(
            dimension_semantics=("parallel",),              # batch -> both TCs on v7x
            vmem_limit_bytes=16 * 1024 * 1024,              # >> actual block footprint, fits all gens
        ),
        cost_estimate=pl.CostEstimate(
            flops=flops, transcendentals=transcendentals,
            bytes_accessed=bytes_accessed),
    )(x, masks, params["wp1"], params["bp1"], params["wd1"], params["bd1"],
      params["wp2"], params["bp2"], params["wd2"], params["bd2"])

    return out.reshape(B, C2, H, W)


def _fold_bn(w, key, cout):
    """Fold BatchNorm2d (running stats + affine) into a bias-free conv weight.

    Weights have output channels on axis 0; bias is returned as (cout, 1).
    """
    kg, kb, km, kv = jax.random.split(key, 4)
    gamma = 1.0 + 0.1 * jax.random.normal(kg, (cout,), jnp.float32)
    beta = 0.1 * jax.random.normal(kb, (cout,), jnp.float32)
    mean = 0.1 * jax.random.normal(km, (cout,), jnp.float32)
    var = jnp.abs(1.0 + 0.1 * jax.random.normal(kv, (cout,), jnp.float32))
    scale = gamma / jnp.sqrt(var + 1e-5)
    return w * scale[:, None], (beta - mean * scale)[:, None]


def make_params(key, c1, c2):
    """Deterministic synthetic parameters, BN folded, output channels on axis 0."""
    c_ = c2 // 2          # GhostConv1 output channels (GhostBottleneck's c_)
    h1 = c_ // 2          # GhostConv1 hidden ("primary") channels
    ks = jax.random.split(key, 8)
    # GhostConv1.cv1: Conv2d(c1, h1, 1) -> (h1, c1)
    wp1 = jax.random.normal(ks[0], (h1, c1), jnp.float32) * (1.0 / np.sqrt(c1))
    wp1, bp1 = _fold_bn(wp1, ks[1], h1)
    # GhostConv1.cv2: Conv2d(h1, h1, 5, groups=h1) -> (h1, 25)
    wd1 = jax.random.normal(ks[2], (h1, 25), jnp.float32) * 0.1
    wd1, bd1 = _fold_bn(wd1, ks[3], h1)
    # GhostConv2.cv1: Conv2d(c_, c_, 1) -> (c_, c_)
    wp2 = jax.random.normal(ks[4], (c_, c_), jnp.float32) * (1.0 / np.sqrt(c_))
    wp2, bp2 = _fold_bn(wp2, ks[5], c_)
    # GhostConv2.cv2: Conv2d(c_, c_, 5, groups=c_) -> (c_, 25)
    wd2 = jax.random.normal(ks[6], (c_, 25), jnp.float32) * 0.1
    wd2, bd2 = _fold_bn(wd2, ks[7], c_)
    return {"wp1": wp1, "bp1": bp1, "wd1": wd1, "bd1": bd1,
            "wp2": wp2, "bp2": bp2, "wd2": wd2, "bd2": bd2}


def ghost_bottleneck_reference(x_nchw, p):
    """Pure-JAX reference of the same math (for correctness check)."""
    silu = lambda t: t * jax.nn.sigmoid(t)

    def pw(t, w, b):  # 1x1 conv (BN folded): w (Cout, Cin), b (Cout, 1)
        return jnp.einsum("oc,bchw->bohw", w, t) + b[None, :, :, None]

    def dw5x5(t, w, b):  # 5x5 depthwise, stride 1, pad 2: w (C, 25), b (C, 1)
        _, _, H_, W_ = t.shape
        tp = jnp.pad(t, ((0, 0), (0, 0), (2, 2), (2, 2)))
        acc = jnp.zeros_like(t)
        for dy in range(5):
            for dx in range(5):
                acc = acc + tp[:, :, dy:dy + H_, dx:dx + W_] * w[None, :, dy * 5 + dx, None, None]
        return acc + b[None, :, :, None]

    y1 = silu(pw(x_nchw, p["wp1"], p["bp1"]))
    y2 = silu(dw5x5(y1, p["wd1"], p["bd1"]))
    z1 = pw(jnp.concatenate([y1, y2], axis=1), p["wp2"], p["bp2"])
    z2 = dw5x5(z1, p["wd2"], p["bd2"])
    return jnp.concatenate([z1, z2], axis=1) + x_nchw


if __name__ == "__main__":
    B, C, H, W = 2, 16, 16, 16                     # c1 == c2 (s=1 residual path)

    key = jax.random.PRNGKey(0)
    kx, kp = jax.random.split(key)
    x = jax.random.normal(kx, (B, C, H, W), jnp.float32)
    params = make_params(kp, C, C)

    out = ghost_bottleneck_forward(x, params)
    out = jax.block_until_ready(out)

    ref = ghost_bottleneck_reference(x, params)
    assert out.shape == (B, C, H, W)
    np.testing.assert_allclose(np.asarray(out), np.asarray(ref), rtol=1e-3, atol=1e-3)

    print("KERNEL_OK")
</pallas_src>

<mosaic_0001>
module attributes {stable_mosaic.version = 11 : i64} {
  func.func @ghost_bottleneck_kernel(%arg0: i32, %arg1: memref<1x16x256xf32, #tpu.memory_space<vmem>>, %arg2: memref<10x256xf32, #tpu.memory_space<vmem>>, %arg3: memref<4x16xf32, #tpu.memory_space<vmem>>, %arg4: memref<4x1xf32, #tpu.memory_space<vmem>>, %arg5: memref<4x25xf32, #tpu.memory_space<vmem>>, %arg6: memref<4x1xf32, #tpu.memory_space<vmem>>, %arg7: memref<8x8xf32, #tpu.memory_space<vmem>>, %arg8: memref<8x1xf32, #tpu.memory_space<vmem>>, %arg9: memref<8x25xf32, #tpu.memory_space<vmem>>, %arg10: memref<8x1xf32, #tpu.memory_space<vmem>>, %arg11: memref<1x16x256xf32, #tpu.memory_space<vmem>>) attributes {dimension_semantics = [#tpu.dimension_semantics<parallel>], iteration_bounds = array<i64: 2>, scalar_prefetch = 0 : i64, scratch_operands = 0 : i64, tpu.core_type = #tpu.core_type<tc>, window_params = [{transform_indices = @transform_0, window_bounds = array<i64: 1, 16, 256>}, {pipeline_mode = #tpu.pipeline_mode<synchronous>, transform_indices = @transform_1, window_bounds = array<i64: 10, 256>}, {pipeline_mode = #tpu.pipeline_mode<synchronous>, transform_indices = @transform_2, window_bounds = array<i64: 4, 16>}, {pipeline_mode = #tpu.pipeline_mode<synchronous>, transform_indices = @transform_3, window_bounds = array<i64: 4, 1>}, {pipeline_mode = #tpu.pipeline_mode<synchronous>, transform_indices = @transform_4, window_bounds = array<i64: 4, 25>}, {pipeline_mode = #tpu.pipeline_mode<synchronous>, transform_indices = @transform_5, window_bounds = array<i64: 4, 1>}, {pipeline_mode = #tpu.pipeline_mode<synchronous>, transform_indices = @transform_6, window_bounds = array<i64: 8, 8>}, {pipeline_mode = #tpu.pipeline_mode<synchronous>, transform_indices = @transform_7, window_bounds = array<i64: 8, 1>}, {pipeline_mode = #tpu.pipeline_mode<synchronous>, transform_indices = @transform_8, window_bounds = array<i64: 8, 25>}, {pipeline_mode = #tpu.pipeline_mode<synchronous>, transform_indices = @transform_9, window_bounds = array<i64: 8, 1>}, {transform_indices = @transform_10, window_bounds = array<i64: 1, 16, 256>}]} {
    %c0 = arith.constant 0 : index
    %c0_0 = arith.constant 0 : index
    %c0_1 = arith.constant 0 : index
    %0 = vector.load %arg1[%c0, %c0_0, %c0_1] : memref<1x16x256xf32, #tpu.memory_space<vmem>>, vector<1x16x256xf32>
    %1 = vector.shape_cast %0 : vector<1x16x256xf32> to vector<16x256xf32>
    %c0_2 = arith.constant 0 : index
    %c0_3 = arith.constant 0 : index
    %2 = vector.load %arg2[%c0_2, %c0_3] : memref<10x256xf32, #tpu.memory_space<vmem>>, vector<10x256xf32>
    %c0_4 = arith.constant 0 : index
    %c0_5 = arith.constant 0 : index
    %3 = vector.load %arg3[%c0_4, %c0_5] : memref<4x16xf32, #tpu.memory_space<vmem>>, vector<4x16xf32>
    %cst = arith.constant dense<0.000000e+00> : vector<4x256xf32>
    %4 = tpu.matmul %3, %1, %cst {dimension_numbers = #tpu.dot_dimension_numbers<[1], [0], [0], [1], [0, 0, 1, 1], [], []>} : vector<4x16xf32>, vector<16x256xf32>, vector<4x256xf32> -> vector<4x256xf32>
    %c0_6 = arith.constant 0 : index
    %c0_7 = arith.constant 0 : index
    %5 = vector.load %arg4[%c0_6, %c0_7] : memref<4x1xf32, #tpu.memory_space<vmem>>, vector<4x1xf32>
    %6 = vector.broadcast %5 : vector<4x1xf32> to vector<4x256xf32>
    %7 = arith.addf %4, %6 : vector<4x256xf32>
    %8 = arith.negf %7 : vector<4x256xf32>
    %9 = math.exp %8 : vector<4x256xf32>
    %cst_8 = arith.constant 1.000000e+00 : f32
    %10 = vector.broadcast %cst_8 : f32 to vector<4x256xf32>
    %11 = arith.addf %10, %9 : vector<4x256xf32>
    %12 = arith.divf %10, %11 : vector<4x256xf32>
    %13 = arith.mulf %7, %12 : vector<4x256xf32>
    %c0_9 = arith.constant 0 : index
    %c0_10 = arith.constant 0 : index
    %14 = vector.load %arg5[%c0_9, %c0_10] : memref<4x25xf32, #tpu.memory_space<vmem>>, vector<4x25xf32>
    %c0_11 = arith.constant 0 : index
    %c0_12 = arith.constant 0 : index
    %15 = vector.load %arg6[%c0_11, %c0_12] : memref<4x1xf32, #tpu.memory_space<vmem>>, vector<4x1xf32>
    %c2_i32 = arith.constant 2 : i32
    %16 = tpu.dynamic_rotate %13 by %c2_i32 dim 1 : vector<4x256xf32>, i32 -> vector<4x256xf32>
    %17 = vector.extract_strided_slice %2 {offsets = [0, 0], sizes = [1, 256], strides = [1, 1]} : vector<10x256xf32> to vector<1x256xf32>
    %18 = vector.broadcast %17 : vector<1x256xf32> to vector<4x256xf32>
    %19 = arith.mulf %16, %18 : vector<4x256xf32>
    %c1_i32 = arith.constant 1 : i32
    %20 = tpu.dynamic_rotate %13 by %c1_i32 dim 1 : vector<4x256xf32>, i32 -> vector<4x256xf32>
    %21 = vector.extract_strided_slice %2 {offsets = [1, 0], sizes = [1, 256], strides = [1, 1]} : vector<10x256xf32> to vector<1x256xf32>
    %22 = vector.broadcast %21 : vector<1x256xf32> to vector<4x256xf32>
    %23 = arith.mulf %20, %22 : vector<4x256xf32>
    %c255_i32 = arith.constant 255 : i32
    %24 = tpu.dynamic_rotate %13 by %c255_i32 dim 1 : vector<4x256xf32>, i32 -> vector<4x256xf32>
    %25 = vector.extract_strided_slice %2 {offsets = [3, 0], sizes = [1, 256], strides = [1, 1]} : vector<10x256xf32> to vector<1x256xf32>
    %26 = vector.broadcast %25 : vector<1x256xf32> to vector<4x256xf32>
    %27 = arith.mulf %24, %26 : vector<4x256xf32>
    %c254_i32 = arith.constant 254 : i32
    %28 = tpu.dynamic_rotate %13 by %c254_i32 dim 1 : vector<4x256xf32>, i32 -> vector<4x256xf32>
    %29 = vector.extract_strided_slice %2 {offsets = [4, 0], sizes = [1, 256], strides = [1, 1]} : vector<10x256xf32> to vector<1x256xf32>
    %30 = vector.broadcast %29 : vector<1x256xf32> to vector<4x256xf32>
    %31 = arith.mulf %28, %30 : vector<4x256xf32>
    %32 = vector.extract_strided_slice %14 {offsets = [0, 0], sizes = [4, 1], strides = [1, 1]} : vector<4x25xf32> to vector<4x1xf32>
    %33 = vector.broadcast %32 : vector<4x1xf32> to vector<4x256xf32>
    %34 = arith.mulf %19, %33 : vector<4x256xf32>
    %35 = vector.extract_strided_slice %14 {offsets = [0, 1], sizes = [4, 1], strides = [1, 1]} : vector<4x25xf32> to vector<4x1xf32>
    %36 = vector.broadcast %35 : vector<4x1xf32> to vector<4x256xf32>
    %37 = arith.mulf %23, %36 : vector<4x256xf32>
    %38 = arith.addf %34, %37 : vector<4x256xf32>
    %39 = vector.extract_strided_slice %14 {offsets = [0, 2], sizes = [4, 1], strides = [1, 1]} : vector<4x25xf32> to vector<4x1xf32>
    %40 = vector.broadcast %39 : vector<4x1xf32> to vector<4x256xf32>
    %41 = arith.mulf %13, %40 : vector<4x256xf32>
    %42 = arith.addf %38, %41 : vector<4x256xf32>
    %43 = vector.extract_strided_slice %14 {offsets = [0, 3], sizes = [4, 1], strides = [1, 1]} : vector<4x25xf32> to vector<4x1xf32>
    %44 = vector.broadcast %43 : vector<4x1xf32> to vector<4x256xf32>
    %45 = arith.mulf %27, %44 : vector<4x256xf32>
    %46 = arith.addf %42, %45 : vector<4x256xf32>
    %47 = vector.extract_strided_slice %14 {offsets = [0, 4], sizes = [4, 1], strides = [1, 1]} : vector<4x25xf32> to vector<4x1xf32>
    %48 = vector.broadcast %47 : vector<4x1xf32> to vector<4x256xf32>
    %49 = arith.mulf %31, %48 : vector<4x256xf32>
    %50 = arith.addf %46, %49 : vector<4x256xf32>
    %c32_i32 = arith.constant 32 : i32
    %51 = tpu.dynamic_rotate %50 by %c32_i32 dim 1 : vector<4x256xf32>, i32 -> vector<4x256xf32>
    %52 = vector.extract_strided_slice %2 {offsets = [5, 0], sizes = [1, 256], strides = [1, 1]} : vector<10x256xf32> to vector<1x256xf32>
    %53 = vector.broadcast %52 : vector<1x256xf32> to vector<4x256xf32>
    %54 = arith.mulf %51, %53 : vector<4x256xf32>
    %55 = vector.extract_strided_slice %14 {offsets = [0, 5], sizes = [4, 1], strides = [1, 1]} : vector<4x25xf32> to vector<4x1xf32>
    %56 = vector.broadcast %55 : vector<4x1xf32> to vector<4x256xf32>
    %57 = arith.mulf %19, %56 : vector<4x256xf32>
    %58 = vector.extract_strided_slice %14 {offsets = [0, 6], sizes = [4, 1], strides = [1, 1]} : vector<4x25xf32> to vector<4x1xf32>
    %59 = vector.broadcast %58 : vector<4x1xf32> to vector<4x256xf32>
    %60 = arith.mulf %23, %59 : vector<4x256xf32>
    %61 = arith.addf %57, %60 : vector<4x256xf32>
    %62 = vector.extract_strided_slice %14 {offsets = [0, 7], sizes = [4, 1], strides = [1, 1]} : vector<4x25xf32> to vector<4x1xf32>
    %63 = vector.broadcast %62 : vector<4x1xf32> to vector<4x256xf32>
    %64 = arith.mulf %13, %63 : vector<4x256xf32>
    %65 = arith.addf %61, %64 : vector<4x256xf32>
    %66 = vector.extract_strided_slice %14 {offsets = [0, 8], sizes = [4, 1], strides = [1, 1]} : vector<4x25xf32> to vector<4x1xf32>
    %67 = vector.broadcast %66 : vector<4x1xf32> to vector<4x256xf32>
    %68 = arith.mulf %27, %67 : vector<4x256xf32>
    %69 = arith.addf %65, %68 : vector<4x256xf32>
    %70 = vector.extract_strided_slice %14 {offsets = [0, 9], sizes = [4, 1], strides = [1, 1]} : vector<4x25xf32> to vector<4x1xf32>
    %71 = vector.broadcast %70 : vector<4x1xf32> to vector<4x256xf32>
    %72 = arith.mulf %31, %71 : vector<4x256xf32>
    %73 = arith.addf %69, %72 : vector<4x256xf32>
    %c16_i32 = arith.constant 16 : i32
    %74 = tpu.dynamic_rotate %73 by %c16_i32 dim 1 : vector<4x256xf32>, i32 -> vector<4x256xf32>
    %75 = vector.extract_strided_slice %2 {offsets = [6, 0], sizes = [1, 256], strides = [1, 1]} : vector<10x256xf32> to vector<1x256xf32>
    %76 = vector.broadcast %75 : vector<1x256xf32> to vector<4x256xf32>
    %77 = arith.mulf %74, %76 : vector<4x256xf32>
    %78 = vector.extract_strided_slice %14 {offsets = [0, 10], sizes = [4, 1], strides = [1, 1]} : vector<4x25xf32> to vector<4x1xf32>
    %79 = vector.broadcast %78 : vector<4x1xf32> to vector<4x256xf32>
    %80 = arith.mulf %19, %79 : vector<4x256xf32>
    %81 = vector.extract_strided_slice %14 {offsets = [0, 11], sizes = [4, 1], strides = [1, 1]} : vector<4x25xf32> to vector<4x1xf32>
    %82 = vector.broadcast %81 : vector<4x1xf32> to vector<4x256xf32>
    %83 = arith.mulf %23, %82 : vector<4x256xf32>
    %84 = arith.addf %80, %83 : vector<4x256xf32>
    %85 = vector.extract_strided_slice %14 {offsets = [0, 12], sizes = [4, 1], strides = [1, 1]} : vector<4x25xf32> to vector<4x1xf32>
    %86 = vector.broadcast %85 : vector<4x1xf32> to vector<4x256xf32>
    %87 = arith.mulf %13, %86 : vector<4x256xf32>
    %88 = arith.addf %84, %87 : vector<4x256xf32>
    %89 = vector.extract_strided_slice %14 {offsets = [0, 13], sizes = [4, 1], strides = [1, 1]} : vector<4x25xf32> to vector<4x1xf32>
    %90 = vector.broadcast %89 : vector<4x1xf32> to vector<4x256xf32>
    %91 = arith.mulf %27, %90 : vector<4x256xf32>
    %92 = arith.addf %88, %91 : vector<4x256xf32>
    %93 = vector.extract_strided_slice %14 {offsets = [0, 14], sizes = [4, 1], strides = [1, 1]} : vector<4x25xf32> to vector<4x1xf32>
    %94 = vector.broadcast %93 : vector<4x1xf32> to vector<4x256xf32>
    %95 = arith.mulf %31, %94 : vector<4x256xf32>
    %96 = arith.addf %92, %95 : vector<4x256xf32>
    %97 = vector.extract_strided_slice %14 {offsets = [0, 15], sizes = [4, 1], strides = [1, 1]} : vector<4x25xf32> to vector<4x1xf32>
    %98 = vector.broadcast %97 : vector<4x1xf32> to vector<4x256xf32>
    %99 = arith.mulf %19, %98 : vector<4x256xf32>
    %100 = vector.extract_strided_slice %14 {offsets = [0, 16], sizes = [4, 1], strides = [1, 1]} : vector<4x25xf32> to vector<4x1xf32>
    %101 = vector.broadcast %100 : vector<4x1xf32> to vector<4x256xf32>
    %102 = arith.mulf %23, %101 : vector<4x256xf32>
    %103 = arith.addf %99, %102 : vector<4x256xf32>
    %104 = vector.extract_strided_slice %14 {offsets = [0, 17], sizes = [4, 1], strides = [1, 1]} : vector<4x25xf32> to vector<4x1xf32>
    %105 = vector.broadcast %104 : vector<4x1xf32> to vector<4x256xf32>
    %106 = arith.mulf %13, %105 : vector<4x256xf32>
    %107 = arith.addf %103, %106 : vector<4x256xf32>
    %108 = vector.extract_strided_slice %14 {offsets = [0, 18], sizes = [4, 1], strides = [1, 1]} : vector<4x25xf32> to vector<4x1xf32>
    %109 = vector.broadcast %108 : vector<4x1xf32> to vector<4x256xf32>
    %110 = arith.mulf %27, %109 : vector<4x256xf32>
    %111 = arith.addf %107, %110 : vector<4x256xf32>
    %112 = vector.extract_strided_slice %14 {offsets = [0, 19], sizes = [4, 1], strides = [1, 1]} : vector<4x25xf32> to vector<4x1xf32>
    %113 = vector.broadcast %112 : vector<4x1xf32> to vector<4x256xf32>
    %114 = arith.mulf %31, %113 : vector<4x256xf32>
    %115 = arith.addf %111, %114 : vector<4x256xf32>
    %c240_i32 = arith.constant 240 : i32
    %116 = tpu.dynamic_rotate %115 by %c240_i32 dim 1 : vector<4x256xf32>, i32 -> vector<4x256xf32>
    %117 = vector.extract_strided_slice %2 {offsets = [8, 0], sizes = [1, 256], strides = [1, 1]} : vector<10x256xf32> to vector<1x256xf32>
    %118 = vector.broadcast %117 : vector<1x256xf32> to vector<4x256xf32>
    %119 = arith.mulf %116, %118 : vector<4x256xf32>
    %120 = vector.extract_strided_slice %14 {offsets = [0, 20], sizes = [4, 1], strides = [1, 1]} : vector<4x25xf32> to vector<4x1xf32>
    %121 = vector.broadcast %120 : vector<4x1xf32> to vector<4x256xf32>
    %122 = arith.mulf %19, %121 : vector<4x256xf32>
    %123 = vector.extract_strided_slice %14 {offsets = [0, 21], sizes = [4, 1], strides = [1, 1]} : vector<4x25xf32> to vector<4x1xf32>
    %124 = vector.broadcast %123 : vector<4x1xf32> to vector<4x256xf32>
    %125 = arith.mulf %23, %124 : vector<4x256xf32>
    %126 = arith.addf %122, %125 : vector<4x256xf32>
    %127 = vector.extract_strided_slice %14 {offsets = [0, 22], sizes = [4, 1], strides = [1, 1]} : vector<4x25xf32> to vector<4x1xf32>
    %128 = vector.broadcast %127 : vector<4x1xf32> to vector<4x256xf32>
    %129 = arith.mulf %13, %128 : vector<4x256xf32>
    %130 = arith.addf %126, %129 : vector<4x256xf32>
    %131 = vector.extract_strided_slice %14 {offsets = [0, 23], sizes = [4, 1], strides = [1, 1]} : vector<4x25xf32> to vector<4x1xf32>
    %132 = vector.broadcast %131 : vector<4x1xf32> to vector<4x256xf32>
    %133 = arith.mulf %27, %132 : vector<4x256xf32>
    %134 = arith.addf %130, %133 : vector<4x256xf32>
    %135 = vector.extract_strided_slice %14 {offsets = [0, 24], sizes = [4, 1], strides = [1, 1]} : vector<4x25xf32> to vector<4x1xf32>
    %136 = vector.broadcast %135 : vector<4x1xf32> to vector<4x256xf32>
    %137 = arith.mulf %31, %136 : vector<4x256xf32>
    %138 = arith.addf %134, %137 : vector<4x256xf32>
    %c224_i32 = arith.constant 224 : i32
    %139 = tpu.dynamic_rotate %138 by %c224_i32 dim 1 : vector<4x256xf32>, i32 -> vector<4x256xf32>
    %140 = vector.extract_strided_slice %2 {offsets = [9, 0], sizes = [1, 256], strides = [1, 1]} : vector<10x256xf32> to vector<1x256xf32>
    %141 = vector.broadcast %140 : vector<1x256xf32> to vector<4x256xf32>
    %142 = arith.mulf %139, %141 : vector<4x256xf32>
    %143 = arith.addf %54, %77 : vector<4x256xf32>
    %144 = arith.addf %96, %119 : vector<4x256xf32>
    %145 = arith.addf %143, %144 : vector<4x256xf32>
    %146 = vector.broadcast %15 : vector<4x1xf32> to vector<4x256xf32>
    %147 = arith.addf %142, %146 : vector<4x256xf32>
    %148 = arith.addf %145, %147 : vector<4x256xf32>
    %149 = arith.negf %148 : vector<4x256xf32>
    %150 = math.exp %149 : vector<4x256xf32>
    %cst_13 = arith.constant 1.000000e+00 : f32
    %151 = vector.broadcast %cst_13 : f32 to vector<4x256xf32>
    %152 = arith.addf %151, %150 : vector<4x256xf32>
    %153 = arith.divf %151, %152 : vector<4x256xf32>
    %154 = arith.mulf %148, %153 : vector<4x256xf32>
    %155 = tpu.concatenate %13, %154 in 0 : vector<4x256xf32>, vector<4x256xf32> -> vector<8x256xf32>
    %c0_14 = arith.constant 0 : index
    %c0_15 = arith.constant 0 : index
    %156 = vector.load %arg7[%c0_14, %c0_15] : memref<8x8xf32, #tpu.memory_space<vmem>>, vector<8x8xf32>
    %cst_16 = arith.constant dense<0.000000e+00> : vector<8x256xf32>
    %157 = tpu.matmul %156, %155, %cst_16 {dimension_numbers = #tpu.dot_dimension_numbers<[1], [0], [0], [1], [0, 0, 1, 1], [], []>} : vector<8x8xf32>, vector<8x256xf32>, vector<8x256xf32> -> vector<8x256xf32>
    %c0_17 = arith.constant 0 : index
    %c0_18 = arith.constant 0 : index
    %158 = vector.load %arg8[%c0_17, %c0_18] : memref<8x1xf32, #tpu.memory_space<vmem>>, vector<8x1xf32>
    %159 = vector.broadcast %158 : vector<8x1xf32> to vector<8x256xf32>
    %160 = arith.addf %157, %159 : vector<8x256xf32>
    %c0_19 = arith.constant 0 : index
    %c0_20 = arith.constant 0 : index
    %161 = vector.load %arg9[%c0_19, %c0_20] : memref<8x25xf32, #tpu.memory_space<vmem>>, vector<8x25xf32>
    %c0_21 = arith.constant 0 : index
    %c0_22 = arith.constant 0 : index
    %162 = vector.load %arg10[%c0_21, %c0_22] : memref<8x1xf32, #tpu.memory_space<vmem>>, vector<8x1xf32>
    %c2_i32_23 = arith.constant 2 : i32
    %163 = tpu.dynamic_rotate %160 by %c2_i32_23 dim 1 : vector<8x256xf32>, i32 -> vector<8x256xf32>
    %164 = vector.extract_strided_slice %2 {offsets = [0, 0], sizes = [1, 256], strides = [1, 1]} : vector<10x256xf32> to vector<1x256xf32>
    %165 = vector.broadcast %164 : vector<1x256xf32> to vector<8x256xf32>
    %166 = arith.mulf %163, %165 : vector<8x256xf32>
    %c1_i32_24 = arith.constant 1 : i32
    %167 = tpu.dynamic_rotate %160 by %c1_i32_24 dim 1 : vector<8x256xf32>, i32 -> vector<8x256xf32>
    %168 = vector.extract_strided_slice %2 {offsets = [1, 0], sizes = [1, 256], strides = [1, 1]} : vector<10x256xf32> to vector<1x256xf32>
    %169 = vector.broadcast %168 : vector<1x256xf32> to vector<8x256xf32>
    %170 = arith.mulf %167, %169 : vector<8x256xf32>
    %c255_i32_25 = arith.constant 255 : i32
    %171 = tpu.dynamic_rotate %160 by %c255_i32_25 dim 1 : vector<8x256xf32>, i32 -> vector<8x256xf32>
    %172 = vector.extract_strided_slice %2 {offsets = [3, 0], sizes = [1, 256], strides = [1, 1]} : vector<10x256xf32> to vector<1x256xf32>
    %173 = vector.broadcast %172 : vector<1x256xf32> to vector<8x256xf32>
    %174 = arith.mulf %171, %173 : vector<8x256xf32>
    %c254_i32_26 = arith.constant 254 : i32
    %175 = tpu.dynamic_rotate %160 by %c254_i32_26 dim 1 : vector<8x256xf32>, i32 -> vector<8x256xf32>
    %176 = vector.extract_strided_slice %2 {offsets = [4, 0], sizes = [1, 256], strides = [1, 1]} : vector<10x256xf32> to vector<1x256xf32>
    %177 = vector.broadcast %176 : vector<1x256xf32> to vector<8x256xf32>
    %178 = arith.mulf %175, %177 : vector<8x256xf32>
    %179 = vector.extract_strided_slice %161 {offsets = [0, 0], sizes = [8, 1], strides = [1, 1]} : vector<8x25xf32> to vector<8x1xf32>
    %180 = vector.broadcast %179 : vector<8x1xf32> to vector<8x256xf32>
    %181 = arith.mulf %166, %180 : vector<8x256xf32>
    %182 = vector.extract_strided_slice %161 {offsets = [0, 1], sizes = [8, 1], strides = [1, 1]} : vector<8x25xf32> to vector<8x1xf32>
    %183 = vector.broadcast %182 : vector<8x1xf32> to vector<8x256xf32>
    %184 = arith.mulf %170, %183 : vector<8x256xf32>
    %185 = arith.addf %181, %184 : vector<8x256xf32>
    %186 = vector.extract_strided_slice %161 {offsets = [0, 2], sizes = [8, 1], strides = [1, 1]} : vector<8x25xf32> to vector<8x1xf32>
    %187 = vector.broadcast %186 : vector<8x1xf32> to vector<8x256xf32>
    %188 = arith.mulf %160, %187 : vector<8x256xf32>
    %189 = arith.addf %185, %188 : vector<8x256xf32>
    %190 = vector.extract_strided_slice %161 {offsets = [0, 3], sizes = [8, 1], strides = [1, 1]} : vector<8x25xf32> to vector<8x1xf32>
    %191 = vector.broadcast %190 : vector<8x1xf32> to vector<8x256xf32>
    %192 = arith.mulf %174, %191 : vector<8x256xf32>
    %193 = arith.addf %189, %192 : vector<8x256xf32>
    %194 = vector.extract_strided_slice %161 {offsets = [0, 4], sizes = [8, 1], strides = [1, 1]} : vector<8x25xf32> to vector<8x1xf32>
    %195 = vector.broadcast %194 : vector<8x1xf32> to vector<8x256xf32>
    %196 = arith.mulf %178, %195 : vector<8x256xf32>
    %197 = arith.addf %193, %196 : vector<8x256xf32>
    %c32_i32_27 = arith.constant 32 : i32
    %198 = tpu.dynamic_rotate %197 by %c32_i32_27 dim 1 : vector<8x256xf32>, i32 -> vector<8x256xf32>
    %199 = vector.extract_strided_slice %2 {offsets = [5, 0], sizes = [1, 256], strides = [1, 1]} : vector<10x256xf32> to vector<1x256xf32>
    %200 = vector.broadcast %199 : vector<1x256xf32> to vector<8x256xf32>
    %201 = arith.mulf %198, %200 : vector<8x256xf32>
    %202 = vector.extract_strided_slice %161 {offsets = [0, 5], sizes = [8, 1], strides = [1, 1]} : vector<8x25xf32> to vector<8x1xf32>
    %203 = vector.broadcast %202 : vector<8x1xf32> to vector<8x256xf32>
    %204 = arith.mulf %166, %203 : vector<8x256xf32>
    %205 = vector.extract_strided_slice %161 {offsets = [0, 6], sizes = [8, 1], strides = [1, 1]} : vector<8x25xf32> to vector<8x1xf32>
    %206 = vector.broadcast %205 : vector<8x1xf32> to vector<8x256xf32>
    %207 = arith.mulf %170, %206 : vector<8x256xf32>
    %208 = arith.addf %204, %207 : vector<8x256xf32>
    %209 = vector.extract_strided_slice %161 {offsets = [0, 7], sizes = [8, 1], strides = [1, 1]} : vector<8x25xf32> to vector<8x1xf32>
    %210 = vector.broadcast %209 : vector<8x1xf32> to vector<8x256xf32>
    %211 = arith.mulf %160, %210 : vector<8x256xf32>
    %212 = arith.addf %208, %211 : vector<8x256xf32>
    %213 = vector.extract_strided_slice %161 {offsets = [0, 8], sizes = [8, 1], strides = [1, 1]} : vector<8x25xf32> to vector<8x1xf32>
    %214 = vector.broadcast %213 : vector<8x1xf32> to vector<8x256xf32>
    %215 = arith.mulf %174, %214 : vector<8x256xf32>
    %216 = arith.addf %212, %215 : vector<8x256xf32>
    %217 = vector.extract_strided_slice %161 {offsets = [0, 9], sizes = [8, 1], strides = [1, 1]} : vector<8x25xf32> to vector<8x1xf32>
    %218 = vector.broadcast %217 : vector<8x1xf32> to vector<8x256xf32>
    %219 = arith.mulf %178, %218 : vector<8x256xf32>
    %220 = arith.addf %216, %219 : vector<8x256xf32>
    %c16_i32_28 = arith.constant 16 : i32
    %221 = tpu.dynamic_rotate %220 by %c16_i32_28 dim 1 : vector<8x256xf32>, i32 -> vector<8x256xf32>
    %222 = vector.extract_strided_slice %2 {offsets = [6, 0], sizes = [1, 256], strides = [1, 1]} : vector<10x256xf32> to vector<1x256xf32>
    %223 = vector.broadcast %222 : vector<1x256xf32> to vector<8x256xf32>
    %224 = arith.mulf %221, %223 : vector<8x256xf32>
    %225 = vector.extract_strided_slice %161 {offsets = [0, 10], sizes = [8, 1], strides = [1, 1]} : vector<8x25xf32> to vector<8x1xf32>
    %226 = vector.broadcast %225 : vector<8x1xf32> to vector<8x256xf32>
    %227 = arith.mulf %166, %226 : vector<8x256xf32>
    %228 = vector.extract_strided_slice %161 {offsets = [0, 11], sizes = [8, 1], strides = [1, 1]} : vector<8x25xf32> to vector<8x1xf32>
    %229 = vector.broadcast %228 : vector<8x1xf32> to vector<8x256xf32>
    %230 = arith.mulf %170, %229 : vector<8x256xf32>
    %231 = arith.addf %227, %230 : vector<8x256xf32>
    %232 = vector.extract_strided_slice %161 {offsets = [0, 12], sizes = [8, 1], strides = [1, 1]} : vector<8x25xf32> to vector<8x1xf32>
    %233 = vector.broadcast %232 : vector<8x1xf32> to vector<8x256xf32>
    %234 = arith.mulf %160, %233 : vector<8x256xf32>
    %235 = arith.addf %231, %234 : vector<8x256xf32>
    %236 = vector.extract_strided_slice %161 {offsets = [0, 13], sizes = [8, 1], strides = [1, 1]} : vector<8x25xf32> to vector<8x1xf32>
    %237 = vector.broadcast %236 : vector<8x1xf32> to vector<8x256xf32>
    %238 = arith.mulf %174, %237 : vector<8x256xf32>
    %239 = arith.addf %235, %238 : vector<8x256xf32>
    %240 = vector.extract_strided_slice %161 {offsets = [0, 14], sizes = [8, 1], strides = [1, 1]} : vector<8x25xf32> to vector<8x1xf32>
    %241 = vector.broadcast %240 : vector<8x1xf32> to vector<8x256xf32>
    %242 = arith.mulf %178, %241 : vector<8x256xf32>
    %243 = arith.addf %239, %242 : vector<8x256xf32>
    %244 = vector.extract_strided_slice %161 {offsets = [0, 15], sizes = [8, 1], strides = [1, 1]} : vector<8x25xf32> to vector<8x1xf32>
    %245 = vector.broadcast %244 : vector<8x1xf32> to vector<8x256xf32>
    %246 = arith.mulf %166, %245 : vector<8x256xf32>
    %247 = vector.extract_strided_slice %161 {offsets = [0, 16], sizes = [8, 1], strides = [1, 1]} : vector<8x25xf32> to vector<8x1xf32>
    %248 = vector.broadcast %247 : vector<8x1xf32> to vector<8x256xf32>
    %249 = arith.mulf %170, %248 : vector<8x256xf32>
    %250 = arith.addf %246, %249 : vector<8x256xf32>
    %251 = vector.extract_strided_slice %161 {offsets = [0, 17], sizes = [8, 1], strides = [1, 1]} : vector<8x25xf32> to vector<8x1xf32>
    %252 = vector.broadcast %251 : vector<8x1xf32> to vector<8x256xf32>
    %253 = arith.mulf %160, %252 : vector<8x256xf32>
    %254 = arith.addf %250, %253 : vector<8x256xf32>
    %255 = vector.extract_strided_slice %161 {offsets = [0, 18], sizes = [8, 1], strides = [1, 1]} : vector<8x25xf32> to vector<8x1xf32>
    %256 = vector.broadcast %255 : vector<8x1xf32> to vector<8x256xf32>
    %257 = arith.mulf %174, %256 : vector<8x256xf32>
    %258 = arith.addf %254, %257 : vector<8x256xf32>
    %259 = vector.extract_strided_slice %161 {offsets = [0, 19], sizes = [8, 1], strides = [1, 1]} : vector<8x25xf32> to vector<8x1xf32>
    %260 = vector.broadcast %259 : vector<8x1xf32> to vector<8x256xf32>
    %261 = arith.mulf %178, %260 : vector<8x256xf32>
    %262 = arith.addf %258, %261 : vector<8x256xf32>
    %c240_i32_29 = arith.constant 240 : i32
    %263 = tpu.dynamic_rotate %262 by %c240_i32_29 dim 1 : vector<8x256xf32>, i32 -> vector<8x256xf32>
    %264 = vector.extract_strided_slice %2 {offsets = [8, 0], sizes = [1, 256], strides = [1, 1]} : vector<10x256xf32> to vector<1x256xf32>
    %265 = vector.broadcast %264 : vector<1x256xf32> to vector<8x256xf32>
    %266 = arith.mulf %263, %265 : vector<8x256xf32>
    %267 = vector.extract_strided_slice %161 {offsets = [0, 20], sizes = [8, 1], strides = [1, 1]} : vector<8x25xf32> to vector<8x1xf32>
    %268 = vector.broadcast %267 : vector<8x1xf32> to vector<8x256xf32>
    %269 = arith.mulf %166, %268 : vector<8x256xf32>
    %270 = vector.extract_strided_slice %161 {offsets = [0, 21], sizes = [8, 1], strides = [1, 1]} : vector<8x25xf32> to vector<8x1xf32>
    %271 = vector.broadcast %270 : vector<8x1xf32> to vector<8x256xf32>
    %272 = arith.mulf %170, %271 : vector<8x256xf32>
    %273 = arith.addf %269, %272 : vector<8x256xf32>
    %274 = vector.extract_strided_slice %161 {offsets = [0, 22], sizes = [8, 1], strides = [1, 1]} : vector<8x25xf32> to vector<8x1xf32>
    %275 = vector.broadcast %274 : vector<8x1xf32> to vector<8x256xf32>
    %276 = arith.mulf %160, %275 : vector<8x256xf32>
    %277 = arith.addf %273, %276 : vector<8x256xf32>
    %278 = vector.extract_strided_slice %161 {offsets = [0, 23], sizes = [8, 1], strides = [1, 1]} : vector<8x25xf32> to vector<8x1xf32>
    %279 = vector.broadcast %278 : vector<8x1xf32> to vector<8x256xf32>
    %280 = arith.mulf %174, %279 : vector<8x256xf32>
    %281 = arith.addf %277, %280 : vector<8x256xf32>
    %282 = vector.extract_strided_slice %161 {offsets = [0, 24], sizes = [8, 1], strides = [1, 1]} : vector<8x25xf32> to vector<8x1xf32>
    %283 = vector.broadcast %282 : vector<8x1xf32> to vector<8x256xf32>
    %284 = arith.mulf %178, %283 : vector<8x256xf32>
    %285 = arith.addf %281, %284 : vector<8x256xf32>
    %c224_i32_30 = arith.constant 224 : i32
    %286 = tpu.dynamic_rotate %285 by %c224_i32_30 dim 1 : vector<8x256xf32>, i32 -> vector<8x256xf32>
    %287 = vector.extract_strided_slice %2 {offsets = [9, 0], sizes = [1, 256], strides = [1, 1]} : vector<10x256xf32> to vector<1x256xf32>
    %288 = vector.broadcast %287 : vector<1x256xf32> to vector<8x256xf32>
    %289 = arith.mulf %286, %288 : vector<8x256xf32>
    %290 = arith.addf %201, %224 : vector<8x256xf32>
    %291 = arith.addf %243, %266 : vector<8x256xf32>
    %292 = arith.addf %290, %291 : vector<8x256xf32>
    %293 = vector.broadcast %162 : vector<8x1xf32> to vector<8x256xf32>
    %294 = arith.addf %289, %293 : vector<8x256xf32>
    %295 = arith.addf %292, %294 : vector<8x256xf32>
    %296 = tpu.concatenate %160, %295 in 0 : vector<8x256xf32>, vector<8x256xf32> -> vector<16x256xf32>
    %297 = arith.addf %296, %1 : vector<16x256xf32>
    %c0_31 = arith.constant 0 : index
    %c0_32 = arith.constant 0 : index
    %c0_33 = arith.constant 0 : index
    %298 = vector.load %arg11[%c0_31, %c0_32, %c0_33] : memref<1x16x256xf32, #tpu.memory_space<vmem>>, vector<1x16x256xf32>
    %299 = vector.shape_cast %298 : vector<1x16x256xf32> to vector<16x256xf32>
    %300 = vector.shape_cast %297 : vector<16x256xf32> to vector<1x16x256xf32>
    tpu.vector_store %arg11[%c0_31, %c0_32, %c0_33], %300 {strides = array<i32>} : memref<1x16x256xf32, #tpu.memory_space<vmem>>, vector<1x16x256xf32>,
    return
  }
  func.func @transform_0(%arg0: i32) -> (i32, i32, i32) {
    %c0_i32 = arith.constant 0 : i32
    %c0_i32_0 = arith.constant 0 : i32
    %c0_i32_1 = arith.constant 0 : i32
    return %arg0, %c0_i32, %c0_i32_0 : i32, i32, i32
  }
  func.func @transform_1(%arg0: i32) -> (i32, i32) {
    %c0_i32 = arith.constant 0 : i32
    %c0_i32_0 = arith.constant 0 : i32
    %c0_i32_1 = arith.constant 0 : i32
    return %c0_i32, %c0_i32_0 : i32, i32
  }
  func.func @transform_2(%arg0: i32) -> (i32, i32) {
    %c0_i32 = arith.constant 0 : i32
    %c0_i32_0 = arith.constant 0 : i32
    %c0_i32_1 = arith.constant 0 : i32
    return %c0_i32, %c0_i32_0 : i32, i32
  }
  func.func @transform_3(%arg0: i32) -> (i32, i32) {
    %c0_i32 = arith.constant 0 : i32
    %c0_i32_0 = arith.constant 0 : i32
    %c0_i32_1 = arith.constant 0 : i32
    return %c0_i32, %c0_i32_0 : i32, i32
  }
  func.func @transform_4(%arg0: i32) -> (i32, i32) {
    %c0_i32 = arith.constant 0 : i32
    %c0_i32_0 = arith.constant 0 : i32
    %c0_i32_1 = arith.constant 0 : i32
    return %c0_i32, %c0_i32_0 : i32, i32
  }
  func.func @transform_5(%arg0: i32) -> (i32, i32) {
    %c0_i32 = arith.constant 0 : i32
    %c0_i32_0 = arith.constant 0 : i32
    %c0_i32_1 = arith.constant 0 : i32
    return %c0_i32, %c0_i32_0 : i32, i32
  }
  func.func @transform_6(%arg0: i32) -> (i32, i32) {
    %c0_i32 = arith.constant 0 : i32
    %c0_i32_0 = arith.constant 0 : i32
    %c0_i32_1 = arith.constant 0 : i32
    return %c0_i32, %c0_i32_0 : i32, i32
  }
  func.func @transform_7(%arg0: i32) -> (i32, i32) {
    %c0_i32 = arith.constant 0 : i32
    %c0_i32_0 = arith.constant 0 : i32
    %c0_i32_1 = arith.constant 0 : i32
    return %c0_i32, %c0_i32_0 : i32, i32
  }
  func.func @transform_8(%arg0: i32) -> (i32, i32) {
    %c0_i32 = arith.constant 0 : i32
    %c0_i32_0 = arith.constant 0 : i32
    %c0_i32_1 = arith.constant 0 : i32
    return %c0_i32, %c0_i32_0 : i32, i32
  }
  func.func @transform_9(%arg0: i32) -> (i32, i32) {
    %c0_i32 = arith.constant 0 : i32
    %c0_i32_0 = arith.constant 0 : i32
    %c0_i32_1 = arith.constant 0 : i32
    return %c0_i32, %c0_i32_0 : i32, i32
  }
  func.func @transform_10(%arg0: i32) -> (i32, i32, i32) {
    %c0_i32 = arith.constant 0 : i32
    %c0_i32_0 = arith.constant 0 : i32
    %c0_i32_1 = arith.constant 0 : i32
    return %arg0, %c0_i32, %c0_i32_0 : i32, i32, i32
  }
}

</mosaic_0001>

<bundles_post_ra>
// kernel: ghost_bottleneck_forward.1
= control target key start
LH: loop header
LB: loop body
LE: loop exit
PB: predicated region body
PF: predicated region fallthrough
CT: control target
= control target key end

     0   :  { %s1476_s13 = smov 0   ;;  %s2148_s0 = inlined_call_operand.vmem [shape: f32[2,16,256], index: 0, kind: input, shape index: {}, may-alias: {0,10}]   ;;  %s2149_s1 = inlined_call_operand.vmem [shape: f32[10,256], index: 1, kind: input, shape index: {}]   ;;  %s2150_s2 = inlined_call_operand.vmem [shape: f32[4,16], index: 2, kind: input, shape index: {}]   ;;  %s2151_s3 = inlined_call_operand.vmem [shape: f32[4,1], index: 3, kind: input, shape index: {}]   ;;  %s2152_s4 = inlined_call_operand.vmem [shape: f32[4,25], index: 4, kind: input, shape index: {}]   ;;  %s2153_s5 = inlined_call_operand.vmem [shape: f32[4,1], index: 5, kind: input, shape index: {}]   ;;  %s2154_s6 = inlined_call_operand.vmem [shape: f32[8,8], index: 6, kind: input, shape index: {}]   ;;  %s2155_s7 = inlined_call_operand.vmem [shape: f32[8,1], index: 7, kind: input, shape index: {}]   ;;  %s2156_s8 = inlined_call_operand.vmem [shape: f32[8,25], index: 8, kind: input, shape index: {}]   ;;  %s2157_s9 = inlined_call_operand.vmem [shape: f32[8,1], index: 9, kind: input, shape index: {}]   ;;  %s2158_s10 = inlined_call_operand.vmem [shape: f32[2,16,256], index: 10, kind: output, shape index: {}, may-alias: {0,10}]  }
   0x1 LB: > { %s1250_s14 = sadd.s32 4294967295, %s1385_s13   ;;  %p1254_p0 = scmp.ge.s32.totalorder %s1385_s13, 1  ;;  %s1385_s13 = sphi %s1476_s13, %s20_s13  }
   0x2   : > { %p312_p1 = scmp.lt.s32.totalorder %s1385_s13, 3 }
   0x4   : > { %p313_p2 = pnand %p1254_p0, %p312_p1 }
   0x5   : > { %p350_p3 = scmp.lt.s32.totalorder (!%p313_p2), %s1250_s14, 1  ;;  %s1409_s25 = smov (!%p313_p2), 126  }
   0x6   : > { %316 = sbr.rel (%p313_p2) target bundleno = 1045 (0x415), region = 60  ;;  %s1410_s26 = smov (!%p313_p2), 2  }
   0x7   : > { %s1411_s27 = smov (!%p313_p2), 1   ;;  %s1412_s28 = smov (!%p313_p2), 127  }
   0x8   : > { %s1417_s15 = smov (!%p313_p2), 32   ;;  %s1418_s16 = smov (!%p313_p2), 16  }
   0x9   : > { %s1419_s17 = smov (!%p313_p2), 112   ;;  %s1420_s21 = smov (!%p313_p2), 96  }
   0xb   : > { %v1387_v0 = vmov 0.0   ;;  %v1388_v1 = vmov 1   ;;  %v1488_v2 = vld [vmem:[%s2152_s4] sm:$0xf]  ;;  %s2206_s14 = smov (!%p350_p3, %s1250_s14), 1  ;;  %v2161_v4 = vmov 0  }
   0xc   : > { %443 = vmatprep.mubr.f32.mxu0 %v1387_v0  ;;  %1312 = vset.pattern.permute.xlu1 %v1388_v1  ;;  %v369_v3 = vld [vmem:[%s2151_s3] sm:$0xf]  ;;  %s1267_s19 = sshll.u32 %s2206_s14, 5  ;;  %v1390_v8 = vmov 5   ;;  %vm375_vm0 = vcmask 130048   ;;  %v2181_v11 = vmov 15  }
   0xd   : > { %544 = vperm.xlu1 %1312, %v1488_v2   ;;  %1311 = vset.pattern.permute.xlu0 %v2161_v4  ;;  %s354_s22 = scalar_lea.vmem %s2148_s0, %s1267_s19  ;;  %v368_v10 = vld [vmem:[%s2150_s2] sm:$0xf]  ;;  %v2180_v12 = vmov 6   ;;  %v2178_v13 = vmov 16   ;;  %v2176_v14 = vmov 2   ;;  %v2179_v15 = vmov 7   ;;  %s1931_s29 = scalar_lea.vmem %s2158_s10, %s1267_s19 }
   0xe   : > { %372 = vperm.xlu0 %1311, %v369_v3   ;;  %908 = vmatprep.mubr.f32.mxu1 %v1387_v0  ;;  %v1503_v5 = vld [vmem:[%s354_s22 + $0x18] sm:$0xff]  ;;  %v1505_v6 = vld [vmem:[%s354_s22 + $0x10] sm:$0xff]  ;;  %v1507_v7 = vld [vmem:[%s354_s22 + $0x8] sm:$0xff]  ;;  %v2174_v16 = vmov 17   ;;  %v2177_v17 = vmov 21   ;;  %v2170_v18 = vmov 3  }
   0xf   : > { %407 = vmatprep.subr.mxu0 %v1503_v5  ;;  %v1511_v9 = vld [vmem:[%s354_s22] sm:$0xff]  ;;  %v2175_v19 = vmov 18   ;;  %v2168_v20 = vmov 22   ;;  %v2172_v21 = vmov 20   ;;  %v2169_v22 = vmov 8  }
  0x10   : > { %408 = vmatpush1.msra.mxu0 %v1505_v6  ;;  %v2173_v23 = vmov 9   ;;  %v2167_v24 = vmov 4   ;;  %v2166_v25 = vmov 19   ;;  %v2165_v26 = vmov 23  }
  0x11   : > { %1313 = vset.pattern.permute.xlu1 %v1390_v8  ;;  %409 = vmatprep.subr.mxu0 %v1507_v7  ;;  %v2171_v27 = vmov 24   ;;  %v2164_v28 = vmov 10   ;;  %v2163_v44 = vmov 12   ;;  %v2162_v45 = vmov 11  }
  0x12   : > { %593 = vperm.xlu1 %1313, %v1488_v2   ;;  %538 = vperm.xlu0 %1311, %v1488_v2   ;;  %v2160_v46 = vmov 13   ;;  %v2159_v47 = vmov 14   ;;  %vm830_vm9 = vcmask 1043456   ;;  %vm840_vm10 = vcmask 64512  }
  0x13   : > { %410 = vmatpush1.msra.mxu0 %v1511_v9 }
  0x14   : > { %1259 = vmatmul.mubr.msk.f32.vlgmr.msra.gmra.mxu0 %vm375_vm0, %v368_v10 }
  0x16   : > { %1315 = vset.pattern.permute.xlu1 %v2181_v11  ;;  %1314 = vset.pattern.permute.xlu0 %v2180_v12 }
  0x17   : > { %686 = vperm.xlu1 %1315, %v1488_v2   ;;  %599 = vperm.xlu0 %1314, %v1488_v2  }
  0x1b   : > { %1316 = vset.pattern.permute.xlu1 %v2178_v13  ;;  %1317 = vset.pattern.permute.xlu0 %v2176_v14 }
  0x1c   : > { %692 = vperm.xlu1 %1316, %v1488_v2   ;;  %552 = vperm.xlu0 %1317, %v1488_v2  }
  0x20   : > { %1318 = vset.pattern.permute.xlu1 %v2179_v15  ;;  %1320 = vset.pattern.permute.xlu0 %v2172_v21 }
  0x21   : > { %607 = vperm.xlu1 %1318, %v1488_v2   ;;  %741 = vperm.xlu0 %1320, %v1488_v2  }
  0x25   : > { %1319 = vset.pattern.permute.xlu1 %v2174_v16  ;;  %1323 = vset.pattern.permute.xlu0 %v2169_v22 }
  0x26   : > { %700 = vperm.xlu1 %1319, %v1488_v2   ;;  %615 = vperm.xlu0 %1323, %v1488_v2  }
  0x2a   : > { %1321 = vset.pattern.permute.xlu1 %v2177_v17  ;;  %1326 = vset.pattern.permute.xlu0 %v2167_v24 }
  0x2b   : > { %747 = vperm.xlu1 %1321, %v1488_v2   ;;  %568 = vperm.xlu0 %1326, %v1488_v2  }
  0x2f   : > { %1322 = vset.pattern.permute.xlu1 %v2170_v18  ;;  %1329 = vset.pattern.permute.xlu0 %v2165_v26 }
  0x30   : > { %560 = vperm.xlu1 %1322, %v1488_v2   ;;  %763 = vperm.xlu0 %1329, %v1488_v2  }
  0x34   : > { %1324 = vset.pattern.permute.xlu1 %v2175_v19  ;;  %1330 = vset.pattern.permute.xlu0 %v2171_v27 }
  0x35   : > { %708 = vperm.xlu1 %1324, %v1488_v2  }
  0x39   : > { %1325 = vset.pattern.permute.xlu1 %v2168_v20 }
  0x3a   : > { %755 = vperm.xlu1 %1325, %v1488_v2  }
  0x3e   : > { %1327 = vset.pattern.permute.xlu1 %v2173_v23 }
  0x3f   : > { %623 = vperm.xlu1 %1327, %v1488_v2  }
  0x43   : > { %1328 = vset.pattern.permute.xlu1 %v2166_v25 }
  0x44   : > { %716 = vperm.xlu1 %1328, %v1488_v2  }
  0x48   : > { %1331 = vset.pattern.permute.xlu1 %v2164_v28 }
  0x88   : > { %v545_v48 = vpop.permute.xlu1 %544 }
  0x89   : > { %v373_v29 = vpop.permute.xlu0 %372 }
  0x8d   : > { %v1587_v49 = vpop.permute.xlu1 %593  ;;  %v539_v54 = vpop.permute.xlu0 %538 }
  0x92   : > { %v1589_v50 = vpop.permute.xlu1 %686  ;;  %v600_v56 = vpop.permute.xlu0 %599 }
  0x97   : > { %v1591_v51 = vpop.permute.xlu1 %692  ;;  %v1601_v58 = vpop.permute.xlu0 %552 }
  0x9c   : > { %v1593_v52 = vpop.permute.xlu1 %607  ;;  %v1603_v59 = vpop.permute.xlu0 %741 }
  0xa1   : > { %v1595_v53 = vpop.permute.xlu1 %700  ;;  %v1607_v61 = vpop.permute.xlu0 %615 }
  0xa6   : > { %v1597_v55 = vpop.permute.xlu1 %747  ;;  %v1613_v0 = vpop.permute.xlu0 %568 }
  0xab   : > { %v1599_v57 = vpop.permute.xlu1 %560  ;;  %v1617_v10 = vpop.permute.xlu0 %763 }
  0xb0   : > { %v1605_v60 = vpop.permute.xlu1 %708 }
  0xb5   : > { %v1609_v62 = vpop.permute.xlu1 %755 }
  0xba   : > { %v1611_v63 = vpop.permute.xlu1 %623 }
  0xbf   : > { %v1615_v3 = vpop.permute.xlu1 %716 }
  0xd4   : > { %v445_v30 = vpop.f32.mrf.mxu0 }
  0xd5   : > { %v446_v31 = vadd.f32 %v445_v30, %v373_v29 }
  0xd6   : > { %v447_v32 = vpop.f32.mrf.mxu0 }
  0xd7   : > { %v1260_v33 = vmul.f32 -1.442695, %v446_v31  ;;  %v448_v34 = vadd.f32 %v447_v32, %v373_v29 }
  0xd9   : > { %1363 = vpow2.f32 %v1260_v33  ;;  %v1261_v35 = vmul.f32 -1.442695, %v448_v34  ;;  %v1629_v33 = vld [vmem:[%s2149_s1 + $0x8] sm:$0xff] }
  0xdb   : > { %1365 = vpow2.f32 %v1261_v35  ;;  %v1634_v35 = vld [vmem:[%s2149_s1] sm:$0xff] }
  0xe6   : > { %v1364_v36 = vpop.eup %1363 }
  0xe7   : > { %v456_v37 = vadd.f32 1.0, %v1364_v36 }
  0xe8   : > { %v1366_v38 = vpop.eup %1365 }
  0xe9   : > { %1367 = vrcp.f32 %v456_v37  ;;  %v457_v39 = vadd.f32 1.0, %v1366_v38 }
  0xeb   : > { %1369 = vrcp.f32 %v457_v39 }
  0xf6   : > { %v1368_v40 = vpop.eup %1367 }
  0xf7   : > { %v1555_v41 = vmul.f32 %v1368_v40, %v446_v31 }
  0xf8   : > { %v1370_v42 = vpop.eup %1369 }
  0xf9   : > { %519 = vrot.lane.b32.xlu1 %v1555_v41, %s1409_s25  ;;  %466 = vrot.lane.b32.xlu0 %v1555_v41, %s1410_s26  ;;  %v1561_v43 = vmul.f32 %v1370_v42, %v448_v34  ;;  %v610_v20 = vmul.f32 %v1593_v52, %v1555_v41  ;;  %v555_v12 = vmul.f32 %v1601_v58, %v1555_v41 }
  0xfd   : > { %468 = vrot.lane.b32.xlu1 %v1561_v43, %s1410_s26  ;;  %485 = vrot.lane.b32.xlu0 %v1555_v41, %s1411_s27 }
 0x101   : > { %487 = vrot.lane.b32.xlu1 %v1561_v43, %s1411_s27  ;;  %502 = vrot.lane.b32.xlu0 %v1555_v41, %s1412_s28 }
 0x105   : > { %504 = vrot.lane.b32.xlu1 %v1561_v43, %s1412_s28  ;;  %771 = vperm.xlu0 %1330, %v1488_v2  }
 0x109   : > { %521 = vrot.lane.b32.xlu1 %v1561_v43, %s1409_s25  ;;  %1333 = vset.pattern.permute.xlu0 %v2163_v44 }
 0x10a   : > { %662 = vperm.xlu0 %1333, %v1488_v2  }
 0x10d   : > { %648 = vperm.xlu1 %1331, %v1488_v2  }
 0x10e   : > { %1336 = vset.pattern.permute.xlu0 %v2161_v4 }
 0x111   : > { %1332 = vset.pattern.permute.xlu1 %v2162_v45 }
 0x112   : > { %654 = vperm.xlu1 %1332, %v1488_v2  }
 0x116   : > { %1334 = vset.pattern.permute.xlu1 %v2160_v46 }
 0x117   : > { %670 = vperm.xlu1 %1334, %v1488_v2  }
 0x11b   : > { %1335 = vset.pattern.permute.xlu1 %v2159_v47 }
 0x11c   : > { %678 = vperm.xlu1 %1335, %v1488_v2   ;;  %v470_v2 = vlaneseq }
 0x11e   : > { %v1619_v29 = vshrl.u32 %v470_v2, 7  ;;  %v1621_v30 = vand.u32 127, %v470_v2 }
 0x120   : > { %1337 = vset.pattern.permute.xlu1 %v2161_v4  ;;  %v1624_v31 = vsub.s32 0, %v1619_v29  ;;  %vm472_vm1 = vcmp.lt.s32.totalorder %v1621_v30, 2  ;;  %v1638_v36 = vsub.s32 1, %v1619_v29  ;;  %v511_v2 = vsub.s32 3, %v1619_v29 }
 0x121   : > { %vm489_vm2 = vcmp.lt.s32.totalorder %v1621_v30, 1  ;;  %vm506_vm3 = vcmp.lt.s32.totalorder %v1621_v30, 127  ;;  %v528_v24 = vsub.s32 4, %v1619_v29  ;;  %vm523_vm4 = vcmp.lt.s32.totalorder %v1621_v30, 126 }
 0x122   : > { %v1642_v37 = vrot.slane %v1629_v33, %v1624_v31  ;;  %v1646_v38 = vrot.slane %v1634_v35, %v1624_v31  ;;  %v1656_v46 = vrot.slane %v1634_v35, %v1638_v36  ;;  %v1660_v4 = vrot.slane %v1629_v33, %v1638_v36 }
 0x123   : > { %v1674_v26 = vrot.slane %v1634_v35, %v511_v2  ;;  %vm727_vm5 = vcmp.lt.s32.totalorder %v1621_v30, 112  ;;  %vm634_vm6 = vcmp.lt.s32.totalorder %v1621_v30, 16  ;;  %vm579_vm7 = vcmp.lt.s32.totalorder %v1621_v30, 32 }
 0x124   : > { %vm782_vm8 = vcmp.lt.s32.totalorder %v1621_v30, 96 }
 0x16b   : > { %v520_v32 = vpop.permute.xlu1 %519  ;;  %v467_v34 = vpop.permute.xlu0 %466 }
 0x16f   : > { %v469_v39 = vpop.permute.xlu1 %468  ;;  %v486_v47 = vpop.permute.xlu0 %485 }
 0x170   : > { %v473_v40 = vsel %vm472_vm1, %v467_v34, %v469_v39  ;;  %v474_v42 = vsel %vm472_vm1, %v469_v39, %v467_v34 }
 0x171   : > { %v1663_v45 = vmul.f32 %v1642_v37, %v473_v40  ;;  %v1666_v44 = vmul.f32 %v1646_v38, %v474_v42  ;;  %v1683_v42 = vrot.slane %v1629_v33, %v511_v2 }
 0x173   : > { %v488_v34 = vpop.permute.xlu1 %487  ;;  %v541_v18 = vmul.f32 %v539_v54, %v1666_v44  ;;  %v597_v27 = vmul.f32 %v1587_v49, %v1663_v45  ;;  %v596_v17 = vmul.f32 %v1587_v49, %v1666_v44 }
 0x174   : > { %v490_v39 = vsel %vm489_vm2, %v486_v47, %v488_v34  ;;  %v491_v28 = vsel %vm489_vm2, %v488_v34, %v486_v47  ;;  %v556_v47 = vmul.f32 %v1601_v58, %v1561_v43  ;;  %v542_v34 = vmul.f32 %v539_v54, %v1663_v45 }
 0x175   : > { %v1677_v25 = vmul.f32 %v1656_v46, %v491_v28  ;;  %v1680_v40 = vmul.f32 %v1660_v4, %v490_v39  ;;  %v503_v28 = vpop.permute.xlu0 %502  ;;  %v1707_v54 = vrot.slane %v1634_v35, %v528_v24 }
 0x177   : > { %v505_v22 = vpop.permute.xlu1 %504  ;;  %v548_v39 = vmul.f32 %v545_v48, %v1680_v40  ;;  %v547_v2 = vmul.f32 %v545_v48, %v1677_v25  ;;  %v603_v16 = vmul.f32 %v600_v56, %v1680_v40  ;;  %v602_v19 = vmul.f32 %v600_v56, %v1677_v25 }
 0x178   : > { %v507_v21 = vsel %vm506_vm3, %v503_v28, %v505_v22  ;;  %v508_v23 = vsel %vm506_vm3, %v505_v22, %v503_v28  ;;  %v1710_v48 = vrot.slane %v1629_v33, %v528_v24  ;;  %v611_v56 = vmul.f32 %v1593_v52, %v1561_v43 }
 0x179   : > { %v1704_v14 = vmul.f32 %v1683_v42, %v508_v23  ;;  %v1715_v13 = vmul.f32 %v1674_v26, %v507_v21  ;;  %v550_v22 = vadd.f32 %v548_v39, %v542_v34  ;;  %v549_v28 = vadd.f32 %v547_v2, %v541_v18 }
 0x17a   : > { %v605_v15 = vadd.f32 %v603_v16, %v597_v27  ;;  %v703_v23 = vmul.f32 %v1595_v53, %v1555_v41  ;;  %v604_v11 = vadd.f32 %v602_v19, %v596_v17  ;;  %v704_v18 = vmul.f32 %v1595_v53, %v1561_v43 }
 0x17b   : > { %v522_v24 = vpop.permute.xlu1 %521  ;;  %v558_v34 = vadd.f32 %v556_v47, %v550_v22  ;;  %v564_v16 = vmul.f32 %v1599_v57, %v1704_v14  ;;  %v744_v17 = vmul.f32 %v1603_v59, %v1666_v44  ;;  %v750_v19 = vmul.f32 %v1597_v55, %v1677_v25 }
 0x17c   : > { %v524_v49 = vsel %vm523_vm4, %v520_v32, %v522_v24  ;;  %v525_v21 = vsel %vm523_vm4, %v522_v24, %v520_v32  ;;  %v557_v58 = vadd.f32 %v555_v12, %v549_v28  ;;  %v563_v32 = vmul.f32 %v1599_v57, %v1715_v13 }
 0x17d   : > { %v1732_v27 = vmul.f32 %v1707_v54, %v524_v49  ;;  %v1735_v52 = vmul.f32 %v1710_v48, %v525_v21  ;;  %v613_v47 = vadd.f32 %v611_v56, %v605_v15  ;;  %v566_v39 = vadd.f32 %v564_v16, %v558_v34 }
 0x17e   : > { %v619_v22 = vmul.f32 %v1607_v61, %v1704_v14  ;;  %v565_v24 = vadd.f32 %v563_v32, %v557_v58  ;;  %v612_v21 = vadd.f32 %v610_v20, %v604_v11  ;;  %v618_v12 = vmul.f32 %v1607_v61, %v1715_v13 }
 0x17f   : > { %v572_v53 = vmul.f32 %v1613_v0, %v1735_v52  ;;  %v571_v2 = vmul.f32 %v1613_v0, %v1732_v27  ;;  %v627_v49 = vmul.f32 %v1611_v63, %v1735_v52  ;;  %v690_v15 = vmul.f32 %v1589_v50, %v1663_v45 }
 0x180   : > { %v696_v28 = vmul.f32 %v1591_v51, %v1680_v40  ;;  %v689_v0 = vmul.f32 %v1589_v50, %v1666_v44  ;;  %v751_v56 = vmul.f32 %v1597_v55, %v1680_v40  ;;  %v621_v16 = vadd.f32 %v619_v22, %v613_v47  ;;  %v772_v22 = vpop.permute.xlu0 %771 }
 0x181   : > { %v574_v57 = vadd.f32 %v572_v53, %v566_v39  ;;  %v573_v34 = vadd.f32 %v571_v2, %v565_v24  ;;  %v626_v11 = vmul.f32 %v1611_v63, %v1732_v27  ;;  %v752_v20 = vadd.f32 %v750_v19, %v744_v17 }
 0x182   : > { %v698_v61 = vadd.f32 %v696_v28, %v690_v15  ;;  %v712_v58 = vmul.f32 %v1605_v60, %v1704_v14  ;;  %v695_v32 = vmul.f32 %v1591_v51, %v1677_v25  ;;  %v758_v50 = vmul.f32 %v1609_v62, %v1555_v41 }
 0x183   : > { %577 = vrot.lane.b32.xlu1 %v574_v57, %s1417_s15  ;;  %v745_v55 = vmul.f32 %v1603_v59, %v1663_v45  ;;  %575 = vrot.lane.b32.xlu0 %v573_v34, %s1417_s15  ;;  %v629_v63 = vadd.f32 %v627_v49, %v621_v16  ;;  %v620_v17 = vadd.f32 %v618_v12, %v612_v21 }
 0x184   : > { %v706_v19 = vadd.f32 %v704_v18, %v698_v61  ;;  %v720_v47 = vmul.f32 %v1615_v3, %v1735_v52  ;;  %v697_v39 = vadd.f32 %v695_v32, %v689_v0  ;;  %v711_v53 = vmul.f32 %v1605_v60, %v1715_v13  ;;  %v465_v32 = vld [vmem:[%s2153_s5] sm:$0xf] }
 0x185   : > { %v753_v2 = vadd.f32 %v751_v56, %v745_v55  ;;  %v766_v51 = vmul.f32 %v1617_v10, %v1715_v13  ;;  %v628_v24 = vadd.f32 %v626_v11, %v620_v17  ;;  %v760_v57 = vadd.f32 %v758_v50, %v752_v20  ;;  %v663_v11 = vpop.permute.xlu0 %662 }
 0x186   : > { %v714_v59 = vadd.f32 %v712_v58, %v706_v19  ;;  %v705_v49 = vadd.f32 %v703_v23, %v697_v39  ;;  %v719_v18 = vmul.f32 %v1615_v3, %v1732_v27  ;;  %v759_v60 = vmul.f32 %v1609_v62, %v1561_v43 }
 0x187   : > { %632 = vrot.lane.b32.xlu1 %v629_v63, %s1418_s16  ;;  %630 = vrot.lane.b32.xlu0 %v628_v24, %s1418_s16  ;;  %v774_v12 = vmul.f32 %v772_v22, %v1732_v27  ;;  %v767_v56 = vmul.f32 %v1617_v10, %v1704_v14  ;;  %v768_v34 = vadd.f32 %v766_v51, %v760_v57 }
 0x188   : > { %v649_v21 = vpop.permute.xlu1 %648  ;;  %v722_v15 = vadd.f32 %v720_v47, %v714_v59  ;;  %v713_v28 = vadd.f32 %v711_v53, %v705_v49  ;;  %v761_v0 = vadd.f32 %v759_v60, %v753_v2  ;;  %v775_v3 = vmul.f32 %v772_v22, %v1735_v52 }
 0x189   : > { %v776_v16 = vadd.f32 %v774_v12, %v768_v34  ;;  %v651_v20 = vmul.f32 %v649_v21, %v1666_v44  ;;  %v652_v61 = vmul.f32 %v649_v21, %v1663_v45  ;;  %v665_v55 = vmul.f32 %v663_v11, %v1555_v41 }
 0x18a   : > { %v721_v23 = vadd.f32 %v719_v18, %v713_v28  ;;  %v769_v50 = vadd.f32 %v767_v56, %v761_v0  ;;  %v666_v63 = vmul.f32 %v663_v11, %v1561_v43  ;;  %v2186_v18 = vmov 21  }
 0x18b   : > { %725 = vrot.lane.b32.xlu1 %v722_v15, %s1419_s17  ;;  %v2188_v21 = vmov 18   ;;  %v2189_v60 = vmov 17   ;;  %v2190_v12 = vmov 9   ;;  %v2191_v15 = vmov 20  }
 0x18c   : > { %723 = vrot.lane.b32.xlu0 %v721_v23, %s1419_s17  ;;  %v777_v19 = vadd.f32 %v775_v3, %v769_v50  ;;  %v2192_v28 = vmov 24   ;;  %v2193_v0 = vmov 3   ;;  %v2194_v56 = vmov 8   ;;  %v367_v50 = vld [vmem:[%s2149_s1 + $0x18] sm:$0x3] }
 0x18d   : > { %v655_v62 = vpop.permute.xlu1 %654  ;;  %v2195_v34 = vmov 22   ;;  %v2196_v23 = vmov 4   ;;  %v2197_v3 = vmov 19   ;;  %v2198_v11 = vmov 23  }
 0x18e   : > { %v657_v58 = vmul.f32 %v655_v62, %v1677_v25  ;;  %v658_v10 = vmul.f32 %v655_v62, %v1680_v40  ;;  %v834_v40 = vld [vmem:[%s2155_s7] sm:$0xff] }
 0x18f   : > { %778 = vrot.lane.b32.xlu1 %v776_v16, %s1420_s21 }
 0x190   : > { %v659_v17 = vadd.f32 %v657_v58, %v651_v20  ;;  %v660_v44 = vadd.f32 %v658_v10, %v652_v61  ;;  %803 = vperm.xlu0 %1336, %v465_v32   ;;  %v2199_v58 = vmov 10   ;;  %v366_v32 = vld [vmem:[%s2149_s1 + $0x10] sm:$0x3] }
 0x192   : > { %v671_v45 = vpop.permute.xlu1 %670  ;;  %v667_v25 = vadd.f32 %v665_v55, %v659_v17  ;;  %v668_v47 = vadd.f32 %v666_v63, %v660_v44  ;;  %v639_v55 = vsub.s32 6, %v1619_v29  ;;  %v584_v17 = vsub.s32 5, %v1619_v29 }
 0x193   : > { %v673_v39 = vmul.f32 %v671_v45, %v1715_v13  ;;  %v674_v53 = vmul.f32 %v671_v45, %v1704_v14  ;;  %780 = vrot.lane.b32.xlu1 %v777_v19, %s1420_s21  ;;  %v1817_v13 = vld [vmem:[%s2156_s8] sm:$0xff]  ;;  %v2182_v14 = vmov 15   ;;  %v1868_v44 = vrot.slane %v366_v32, %v1624_v31 }
 0x194   : > { %837 = vperm.xlu0 %1336, %v834_v40   ;;  %v1871_v19 = vrot.slane %v367_v50, %v1624_v31  ;;  %v1879_v40 = vrot.slane %v1634_v35, %v639_v55  ;;  %v1882_v29 = vrot.slane %v1629_v33, %v639_v55 }
 0x195   : > { %v675_v2 = vadd.f32 %v673_v39, %v667_v25  ;;  %v676_v51 = vadd.f32 %v674_v53, %v668_v47  ;;  %v1885_v39 = vrot.slane %v1634_v35, %v584_v17 }
 0x197   : > { %v679_v22 = vpop.permute.xlu1 %678  ;;  %951 = vperm.xlu1 %1337, %v1817_v13  }
 0x198   : > { %v681_v24 = vmul.f32 %v679_v22, %v1732_v27  ;;  %v682_v57 = vmul.f32 %v679_v22, %v1735_v52  ;;  %1338 = vset.pattern.permute.xlu0 %v1388_v1  ;;  %v2183_v1 = vmov 6   ;;  %v2184_v27 = vmov 7  }
 0x199   : > { %957 = vperm.xlu0 %1338, %v1817_v13   ;;  %v2185_v52 = vmov 16  }
 0x19a   : > { %v1810_v59 = vadd.f32 %v681_v24, %v675_v2  ;;  %v1812_v49 = vadd.f32 %v682_v57, %v676_v51  ;;  %v1892_v2 = vrot.slane %v1629_v33, %v584_v17  ;;  %v1904_v33 = vrot.slane %v366_v32, %v1638_v36 }
 0x19b   : > { %1339 = vset.pattern.permute.xlu1 %v1390_v8  ;;  %v2187_v8 = vmov 2  }
 0x19c   : > { %997 = vperm.xlu1 %1339, %v1817_v13  }
 0x19d   : > { %1341 = vset.pattern.permute.xlu0 %v2182_v14 }
 0x19e   : > { %1081 = vperm.xlu0 %1341, %v1817_v13  }
 0x1a0   : > { %1340 = vset.pattern.permute.xlu1 %v2183_v1 }
 0x1a1   : > { %1003 = vperm.xlu1 %1340, %v1817_v13  }
 0x1a2   : > { %1344 = vset.pattern.permute.xlu0 %v2184_v27  ;;  %v1907_v27 = vrot.slane %v367_v50, %v1638_v36 }
 0x1a3   : > { %1011 = vperm.xlu0 %1344, %v1817_v13  }
 0x1a5   : > { %1342 = vset.pattern.permute.xlu1 %v2185_v52 }
 0x1a6   : > { %1087 = vperm.xlu1 %1342, %v1817_v13  }
 0x1a7   : > { %1347 = vset.pattern.permute.xlu0 %v2186_v18 }
 0x1a8   : > { %1133 = vperm.xlu0 %1347, %v1817_v13  }
 0x1aa   : > { %1343 = vset.pattern.permute.xlu1 %v2187_v8 }
 0x1ab   : > { %965 = vperm.xlu1 %1343, %v1817_v13  }
 0x1ac   : > { %1350 = vset.pattern.permute.xlu0 %v2188_v21 }
 0x1ad   : > { %1103 = vperm.xlu0 %1350, %v1817_v13  }
 0x1af   : > { %1345 = vset.pattern.permute.xlu1 %v2189_v60 }
 0x1b0   : > { %1095 = vperm.xlu1 %1345, %v1817_v13  }
 0x1b1   : > { %1353 = vset.pattern.permute.xlu0 %v2190_v12 }
 0x1b2   : > { %1027 = vperm.xlu0 %1353, %v1817_v13  }
 0x1b4   : > { %1346 = vset.pattern.permute.xlu1 %v2191_v15 }
 0x1b5   : > { %1127 = vperm.xlu1 %1346, %v1817_v13  }
 0x1b6   : > { %1356 = vset.pattern.permute.xlu0 %v2192_v28 }
 0x1b9   : > { %1348 = vset.pattern.permute.xlu1 %v2193_v0 }
 0x1ba   : > { %973 = vperm.xlu1 %1348, %v1817_v13  }
 0x1be   : > { %1349 = vset.pattern.permute.xlu1 %v2194_v56 }
 0x1bf   : > { %1019 = vperm.xlu1 %1349, %v1817_v13  }
 0x1c3   : > { %1351 = vset.pattern.permute.xlu1 %v2195_v34 }
 0x1c4   : > { %1141 = vperm.xlu1 %1351, %v1817_v13  }
 0x1c8   : > { %1352 = vset.pattern.permute.xlu1 %v2196_v23 }
 0x1c9   : > { %981 = vperm.xlu1 %1352, %v1817_v13  }
 0x1cd   : > { %1354 = vset.pattern.permute.xlu1 %v2197_v3 }
 0x1ce   : > { %1111 = vperm.xlu1 %1354, %v1817_v13  }
 0x1d2   : > { %1355 = vset.pattern.permute.xlu1 %v2198_v11 }
 0x1d3   : > { %1149 = vperm.xlu1 %1355, %v1817_v13  }
 0x1d7   : > { %1357 = vset.pattern.permute.xlu1 %v2199_v58 }
 0x1f5   : > { %v578_v16 = vpop.permute.xlu1 %577  ;;  %v576_v62 = vpop.permute.xlu0 %575 }
 0x1f6   : > { %v580_v35 = vsel %vm579_vm7, %v576_v62, %v578_v16  ;;  %v581_v57 = vsel %vm579_vm7, %v578_v16, %v576_v62 }
 0x1f7   : > { %v590_v8 = vmul.f32 %v1885_v39, %v581_v57  ;;  %v591_v21 = vmul.f32 %v1892_v2, %v580_v35  ;;  %v2202_v57 = vmov 0  }
 0x1f9   : > { %v633_v20 = vpop.permute.xlu1 %632  ;;  %v631_v61 = vpop.permute.xlu0 %630 }
 0x1fa   : > { %v635_v31 = vsel %vm634_vm6, %v631_v61, %v633_v20  ;;  %v636_v53 = vsel %vm634_vm6, %v633_v20, %v631_v61 }
 0x1fb   : > { %v645_v14 = vmul.f32 %v1879_v40, %v636_v53  ;;  %v646_v1 = vmul.f32 %v1882_v29, %v635_v31  ;;  %v833_v31 = vld [vmem:[%s2154_s6] sm:$0xff] }
 0x1fd   : > { %v726_v10 = vpop.permute.xlu1 %725  ;;  %v795_v15 = vadd.f32 %v645_v14, %v590_v8  ;;  %v796_v28 = vadd.f32 %v646_v1, %v591_v21  ;;  %v2203_v14 = vmov 13   ;;  %v2204_v1 = vmov 14  }
 0x1fe   : > { %v724_v63 = vpop.permute.xlu0 %723 }
 0x1ff   : > { %v728_v25 = vsel %vm727_vm5, %v724_v63, %v726_v10  ;;  %v729_v47 = vsel %vm727_vm5, %v726_v10, %v724_v63 }
 0x200   : > { %v738_v51 = vmul.f32 %v1868_v44, %v728_v25  ;;  %v739_v22 = vmul.f32 %v1871_v19, %v729_v47 }
 0x201   : > { %v779_v45 = vpop.permute.xlu1 %778 }
 0x202   : > { %v797_v60 = vadd.f32 %v738_v51, %v1810_v59  ;;  %v798_v12 = vadd.f32 %v739_v22, %v1812_v49 }
 0x204   : > { %v799_v34 = vadd.f32 %v797_v60, %v795_v15  ;;  %v800_v23 = vadd.f32 %v798_v12, %v796_v28 }
 0x205   : > { %v781_v24 = vpop.permute.xlu1 %780 }
 0x206   : > { %v783_v52 = vsel %vm782_vm8, %v779_v45, %v781_v24  ;;  %v784_v18 = vsel %vm782_vm8, %v781_v24, %v779_v45 }
 0x207   : > { %v793_v0 = vmul.f32 %v1904_v33, %v783_v52  ;;  %v794_v36 = vmul.f32 %v1907_v27, %v784_v18 }
 0x20b   : > { %v804_v56 = vpop.permute.xlu0 %803 }
 0x20c   : > { %v806_v3 = vadd.f32 %v804_v56, %v793_v0  ;;  %v807_v16 = vadd.f32 %v804_v56, %v794_v36 }
 0x20e   : > { %v808_v11 = vadd.f32 %v806_v3, %v799_v34  ;;  %v809_v62 = vadd.f32 %v807_v16, %v800_v23 }
 0x20f   : > { %v838_v53 = vpop.permute.xlu0 %837 }
 0x210   : > { %v1262_v20 = vmul.f32 -1.442695, %v808_v11  ;;  %v1263_v61 = vmul.f32 -1.442695, %v809_v62 }
 0x212   : > { %1371 = vpow2.f32 %v1262_v20  ;;  %v952_v52 = vpop.permute.xlu1 %951 }
 0x213   : > { %1373 = vpow2.f32 %v1263_v61 }
 0x214   : > { %v958_v28 = vpop.permute.xlu0 %957 }
 0x217   : > { %v1968_v18 = vpop.permute.xlu1 %997 }
 0x219   : > { %v1978_v36 = vpop.permute.xlu0 %1081 }
 0x21c   : > { %v1970_v8 = vpop.permute.xlu1 %1003 }
 0x21e   : > { %v1012_v34 = vpop.permute.xlu0 %1011 }
 0x21f   : > { %v1372_v59 = vpop.eup %1371 }
 0x220   : > { %v1374_v58 = vpop.eup %1373  ;;  %v816_v49 = vadd.f32 1.0, %v1372_v59 }
 0x221   : > { %v817_v10 = vadd.f32 1.0, %v1374_v58  ;;  %v1972_v21 = vpop.permute.xlu1 %1087 }
 0x222   : > { %1375 = vrcp.f32 %v816_v49 }
 0x223   : > { %1377 = vrcp.f32 %v817_v10  ;;  %v1134_v23 = vpop.permute.xlu0 %1133 }
 0x226   : > { %v966_v60 = vpop.permute.xlu1 %965 }
 0x228   : > { %v1984_v16 = vpop.permute.xlu0 %1103 }
 0x22b   : > { %v1974_v12 = vpop.permute.xlu1 %1095 }
 0x22f   : > { %v1376_v32 = vpop.eup %1375 }
 0x230   : > { %v1378_v50 = vpop.eup %1377  ;;  %v822_v55 = vmul.f32 %v1376_v32, %v808_v11  ;;  %v1976_v15 = vpop.permute.xlu1 %1127 }
 0x231   : > { %v823_v63 = vmul.f32 %v1378_v50, %v809_v62  ;;  %v1988_v62 = vpop.permute.xlu0 %1027 }
 0x232   : > { %v826_v17 = vrot.slane %v822_v55, 4 }
 0x233   : > { %v827_v45 = vrot.slane %v823_v63, 4 }
 0x234   : > { %v831_v25 = vsel %vm830_vm9, %v1555_v41, %v826_v17 }
 0x235   : > { %v832_v47 = vsel %vm830_vm9, %v1561_v43, %v827_v45  ;;  %v974_v0 = vpop.permute.xlu1 %973 }
 0x236   : > { %874 = vmatprep.subr.mxu1 %v832_v47 }
 0x237   : > { %875 = vmatpush1.msra.mxu1 %v831_v25 }
 0x238   : > { %1264 = vmatmul.mubr.msk.f32.vlgmr.msra.gmra.mxu1 %vm840_vm10, %v833_v31 }
 0x23a   : > { %v1980_v56 = vpop.permute.xlu1 %1019 }
 0x2f8   : > { %v910_v51 = vpop.f32.mrf.mxu1 }
 0x2f9   : > { %v1924_v22 = vadd.f32 %v910_v51, %v838_v53 }
 0x2fa   : > { %v912_v41 = vpop.f32.mrf.mxu1 }
 0x2fb   : > { %v1187_v43 = vadd.f32 %v1924_v22, %v1511_v9  ;;  %v1935_v24 = vadd.f32 %v912_v41, %v838_v53  ;;  %941 = vrot.lane.b32.xlu0 %v1924_v22, %s1409_s25  ;;  %917 = vrot.lane.b32.xlu1 %v1924_v22, %s1410_s26  ;;  %v2201_v9 = vmov 11  }
 0x2fd   : > { %1191 = vst [vmem:[%s1931_s29] sm:$0xff] %v1187_v43  ;;  %v1188_v35 = vadd.f32 %v1935_v24, %v1507_v7  ;;  %v2200_v7 = vmov 12   ;;  %v1015_v53 = vmul.f32 %v1012_v34, %v1935_v24 }
 0x2ff   : > { %1192 = vst [vmem:[%s1931_s29 + $0x8] sm:$0xff] %v1188_v35  ;;  %919 = vrot.lane.b32.xlu0 %v1935_v24, %s1410_s26  ;;  %925 = vrot.lane.b32.xlu1 %v1924_v22, %s1411_s27  ;;  %v969_v35 = vmul.f32 %v966_v60, %v1935_v24 }
 0x303   : > { %927 = vrot.lane.b32.xlu0 %v1935_v24, %s1411_s27  ;;  %933 = vrot.lane.b32.xlu1 %v1924_v22, %s1412_s28 }
 0x307   : > { %935 = vrot.lane.b32.xlu0 %v1935_v24, %s1412_s28  ;;  %943 = vrot.lane.b32.xlu1 %v1935_v24, %s1409_s25 }
 0x30b   : > { %1157 = vperm.xlu0 %1356, %v1817_v13   ;;  %1043 = vperm.xlu1 %1357, %v1817_v13  }
 0x30f   : > { %1359 = vset.pattern.permute.xlu0 %v2200_v7  ;;  %1358 = vset.pattern.permute.xlu1 %v2201_v9 }
 0x310   : > { %1057 = vperm.xlu0 %1359, %v1817_v13   ;;  %1049 = vperm.xlu1 %1358, %v1817_v13  }
 0x314   : > { %1362 = vset.pattern.permute.xlu0 %v2202_v57  ;;  %1360 = vset.pattern.permute.xlu1 %v2203_v14 }
 0x315   : > { %1065 = vperm.xlu1 %1360, %v1817_v13  }
 0x319   : > { %1361 = vset.pattern.permute.xlu1 %v2204_v1 }
 0x31a   : > { %1073 = vperm.xlu1 %1361, %v1817_v13   ;;  %v1982_v13 = vpop.permute.xlu1 %1141 }
 0x31e   : > { %v982_v3 = vpop.permute.xlu1 %981 }
 0x322   : > { %v1986_v11 = vpop.permute.xlu1 %1111 }
 0x326   : > { %v1990_v20 = vpop.permute.xlu1 %1149 }
 0x36d   : > { %v942_v61 = vpop.permute.xlu0 %941  ;;  %v918_v59 = vpop.permute.xlu1 %917 }
 0x371   : > { %v920_v58 = vpop.permute.xlu0 %919  ;;  %v926_v49 = vpop.permute.xlu1 %925 }
 0x372   : > { %v921_v10 = vsel %vm472_vm1, %v918_v59, %v920_v58  ;;  %v922_v32 = vsel %vm472_vm1, %v920_v58, %v918_v59 }
 0x373   : > { %v1997_v50 = vmul.f32 %v921_v10, %v1642_v37  ;;  %v2000_v63 = vmul.f32 %v922_v32, %v1646_v38  ;;  %v1014_v37 = vmul.f32 %v1012_v34, %v1924_v22  ;;  %v968_v38 = vmul.f32 %v966_v60, %v1924_v22 }
 0x375   : > { %v928_v55 = vpop.permute.xlu0 %927  ;;  %v934_v17 = vpop.permute.xlu1 %933  ;;  %v955_v41 = vmul.f32 %v952_v52, %v1997_v50  ;;  %v954_v57 = vmul.f32 %v952_v52, %v2000_v63  ;;  %v1085_v10 = vmul.f32 %v1978_v36, %v1997_v50 }
 0x376   : > { %v929_v45 = vsel %vm489_vm2, %v926_v49, %v928_v55  ;;  %v930_v25 = vsel %vm489_vm2, %v928_v55, %v926_v49 }
 0x377   : > { %v2007_v47 = vmul.f32 %v930_v25, %v1656_v46  ;;  %v2010_v31 = vmul.f32 %v929_v45, %v1660_v4 }
 0x379   : > { %v936_v51 = vpop.permute.xlu0 %935  ;;  %v961_v43 = vmul.f32 %v958_v28, %v2010_v31  ;;  %v960_v7 = vmul.f32 %v958_v28, %v2007_v47  ;;  %v944_v46 = vpop.permute.xlu1 %943  ;;  %v1007_v14 = vmul.f32 %v1970_v8, %v2010_v31 }
 0x37a   : > { %v937_v4 = vsel %vm506_vm3, %v934_v17, %v936_v51  ;;  %v938_v9 = vsel %vm506_vm3, %v936_v51, %v934_v17  ;;  %v945_v1 = vsel %vm523_vm4, %v942_v61, %v944_v46  ;;  %v946_v60 = vsel %vm523_vm4, %v944_v46, %v942_v61 }
 0x37b   : > { %v2031_v28 = vmul.f32 %v937_v4, %v1674_v26  ;;  %v2034_v34 = vmul.f32 %v938_v9, %v1683_v42  ;;  %v2037_v59 = vmul.f32 %v945_v1, %v1707_v54  ;;  %v2040_v52 = vmul.f32 %v946_v60, %v1710_v48 }
 0x37c   : > { %v963_v58 = vadd.f32 %v961_v43, %v955_v41  ;;  %v962_v49 = vadd.f32 %v960_v7, %v954_v57  ;;  %v1099_v26 = vmul.f32 %v1974_v12, %v1935_v24  ;;  %v1136_v54 = vmul.f32 %v1134_v23, %v2007_v47 }
 0x37d   : > { %v977_v32 = vmul.f32 %v974_v0, %v2034_v34  ;;  %v976_v61 = vmul.f32 %v974_v0, %v2031_v28  ;;  %v1001_v48 = vmul.f32 %v1968_v18, %v1997_v50  ;;  %v1091_v17 = vmul.f32 %v1972_v21, %v2010_v31 }
 0x37e   : > { %v971_v42 = vadd.f32 %v969_v35, %v963_v58  ;;  %v970_v55 = vadd.f32 %v968_v38, %v962_v49  ;;  %v985_v45 = vmul.f32 %v982_v3, %v2040_v52  ;;  %v984_v25 = vmul.f32 %v982_v3, %v2037_v59 }
 0x37f   : > { %v1130_v0 = vmul.f32 %v1976_v15, %v2000_v63  ;;  %v1009_v43 = vadd.f32 %v1007_v14, %v1001_v48  ;;  %v1023_v38 = vmul.f32 %v1980_v56, %v2034_v34  ;;  %v1137_v35 = vmul.f32 %v1134_v23, %v2010_v31 }
 0x380   : > { %v979_v51 = vadd.f32 %v977_v32, %v971_v42  ;;  %v978_v41 = vadd.f32 %v976_v61, %v970_v55  ;;  %v1000_v7 = vmul.f32 %v1968_v18, %v2000_v63  ;;  %v1006_v46 = vmul.f32 %v1970_v8, %v2007_v47 }
 0x381   : > { %v1084_v3 = vmul.f32 %v1978_v36, %v2000_v63  ;;  %v1138_v57 = vadd.f32 %v1136_v54, %v1130_v0  ;;  %v1017_v1 = vadd.f32 %v1015_v53, %v1009_v43  ;;  %v1022_v14 = vmul.f32 %v1980_v56, %v2031_v28 }
 0x382   : > { %v987_v4 = vadd.f32 %v985_v45, %v979_v51  ;;  %v986_v9 = vadd.f32 %v984_v25, %v978_v41  ;;  %v1008_v60 = vadd.f32 %v1006_v46, %v1000_v7  ;;  %v1093_v58 = vadd.f32 %v1091_v17, %v1085_v10 }
 0x383   : > { %v1107_v23 = vmul.f32 %v1984_v16, %v2034_v34  ;;  %v1025_v18 = vadd.f32 %v1023_v38, %v1017_v1  ;;  %v1031_v8 = vmul.f32 %v1988_v62, %v2040_v52  ;;  %v1090_v36 = vmul.f32 %v1972_v21, %v2007_v47 }
 0x384   : > { %990 = vrot.lane.b32.xlu1 %v987_v4, %s1417_s15  ;;  %988 = vrot.lane.b32.xlu0 %v986_v9, %s1417_s15  ;;  %v1144_v53 = vmul.f32 %v1982_v13, %v1924_v22  ;;  %v1131_v56 = vmul.f32 %v1976_v15, %v1997_v50  ;;  %v1016_v49 = vadd.f32 %v1014_v37, %v1008_v60 }
 0x385   : > { %v1101_v10 = vadd.f32 %v1099_v26, %v1093_v58  ;;  %v1033_v61 = vadd.f32 %v1031_v8, %v1025_v18  ;;  %v1092_v42 = vadd.f32 %v1090_v36, %v1084_v3  ;;  %v1098_v55 = vmul.f32 %v1974_v12, %v1924_v22 }
 0x386   : > { %v1158_v32 = vpop.permute.xlu0 %1157  ;;  %v1106_v54 = vmul.f32 %v1984_v16, %v2031_v28  ;;  %v1044_v48 = vpop.permute.xlu1 %1043  ;;  %v1139_v17 = vadd.f32 %v1137_v35, %v1131_v56  ;;  %v1024_v21 = vadd.f32 %v1022_v14, %v1016_v49  ;;  %v1030_v45 = vmul.f32 %v1988_v62, %v2037_v59 }
 0x387   : > { %v1109_v25 = vadd.f32 %v1107_v23, %v1101_v10  ;;  %v1146_v0 = vadd.f32 %v1144_v53, %v1138_v57  ;;  %v1152_v15 = vmul.f32 %v1990_v20, %v2031_v28  ;;  %v1115_v37 = vmul.f32 %v1986_v11, %v2040_v52 }
 0x388   : > { %1036 = vrot.lane.b32.xlu1 %v1033_v61, %s1418_s16  ;;  %v1100_v12 = vadd.f32 %v1098_v55, %v1092_v42  ;;  %v1032_v26 = vadd.f32 %v1030_v45, %v1024_v21  ;;  %v1145_v16 = vmul.f32 %v1982_v13, %v1935_v24  ;;  %v1160_v51 = vmul.f32 %v1158_v32, %v2037_v59 }
 0x389   : > { %v1117_v41 = vadd.f32 %v1115_v37, %v1109_v25  ;;  %v1114_v62 = vmul.f32 %v1986_v11, %v2037_v59  ;;  %v1046_v38 = vmul.f32 %v1044_v48, %v2000_v63  ;;  %v1153_v7 = vmul.f32 %v1990_v20, %v2034_v34 }
 0x38a   : > { %v1108_v43 = vadd.f32 %v1106_v54, %v1100_v12  ;;  %1034 = vrot.lane.b32.xlu0 %v1032_v26, %s1418_s16  ;;  %v1147_v35 = vadd.f32 %v1145_v16, %v1139_v17  ;;  %v1154_v46 = vadd.f32 %v1152_v15, %v1146_v0  ;;  %v1047_v4 = vmul.f32 %v1044_v48, %v1997_v50  ;;  %v916_v50 = vld [vmem:[%s2157_s9] sm:$0xff] }
 0x38b   : > { %v1050_v3 = vpop.permute.xlu1 %1049  ;;  %v1058_v13 = vpop.permute.xlu0 %1057  ;;  %v1161_v11 = vmul.f32 %v1158_v32, %v2040_v52 }
 0x38c   : > { %1120 = vrot.lane.b32.xlu1 %v1117_v41, %s1419_s17  ;;  %v1052_v9 = vmul.f32 %v1050_v3, %v2007_v47  ;;  %v1053_v57 = vmul.f32 %v1050_v3, %v2010_v31  ;;  %v1116_v1 = vadd.f32 %v1114_v62, %v1108_v43  ;;  %v1162_v60 = vadd.f32 %v1160_v51, %v1154_v46 }
 0x38d   : > { %v1060_v20 = vmul.f32 %v1058_v13, %v1924_v22  ;;  %v1061_v58 = vmul.f32 %v1058_v13, %v1935_v24  ;;  %v1155_v23 = vadd.f32 %v1153_v7, %v1147_v35 }
 0x38e   : > { %v1054_v63 = vadd.f32 %v1052_v9, %v1046_v38  ;;  %v1055_v14 = vadd.f32 %v1053_v57, %v1047_v4  ;;  %1118 = vrot.lane.b32.xlu0 %v1116_v1, %s1419_s17 }
 0x38f   : > { %v1163_v8 = vadd.f32 %v1161_v11, %v1155_v23 }
 0x390   : > { %1164 = vrot.lane.b32.xlu1 %v1162_v60, %s1420_s21  ;;  %v1062_v47 = vadd.f32 %v1060_v20, %v1054_v63  ;;  %v1063_v31 = vadd.f32 %v1061_v58, %v1055_v14  ;;  %v1066_v18 = vpop.permute.xlu1 %1065 }
 0x391   : > { %v1068_v36 = vmul.f32 %v1066_v18, %v2031_v28  ;;  %v1069_v53 = vmul.f32 %v1066_v18, %v2034_v34 }
 0x392   : > { %1180 = vperm.xlu0 %1362, %v916_v50  }
 0x393   : > { %v1070_v56 = vadd.f32 %v1068_v36, %v1062_v47  ;;  %v1071_v22 = vadd.f32 %v1069_v53, %v1063_v31 }
 0x394   : > { %1166 = vrot.lane.b32.xlu1 %v1163_v8, %s1420_s21 }
 0x395   : > { %v1074_v24 = vpop.permute.xlu1 %1073 }
 0x396   : > { %v1076_v49 = vmul.f32 %v1074_v24, %v2037_v59  ;;  %v1077_v10 = vmul.f32 %v1074_v24, %v2040_v52 }
 0x398   : > { %v1078_v32 = vadd.f32 %v1076_v49, %v1070_v56  ;;  %v1079_v61 = vadd.f32 %v1077_v10, %v1071_v22 }
 0x3f6   : > { %v991_v42 = vpop.permute.xlu1 %990  ;;  %v989_v55 = vpop.permute.xlu0 %988 }
 0x3f7   : > { %v992_v37 = vsel %vm579_vm7, %v989_v55, %v991_v42  ;;  %v993_v12 = vsel %vm579_vm7, %v991_v42, %v989_v55 }
 0x3fa   : > { %v1037_v54 = vpop.permute.xlu1 %1036 }
 0x3fc   : > { %v1035_v48 = vpop.permute.xlu0 %1034 }
 0x3fd   : > { %v1038_v59 = vsel %vm634_vm6, %v1035_v48, %v1037_v54  ;;  %v1039_v52 = vsel %vm634_vm6, %v1037_v54, %v1035_v48 }
 0x3fe   : > { %v1121_v17 = vpop.permute.xlu1 %1120  ;;  %v1040_v26 = vmul.f32 %v1039_v52, %v1879_v40  ;;  %v1041_v16 = vmul.f32 %v1038_v59, %v1882_v29 }
 0x400   : > { %v1119_v28 = vpop.permute.xlu0 %1118 }
 0x401   : > { %v1122_v34 = vsel %vm727_vm5, %v1119_v28, %v1121_v17  ;;  %v1123_v45 = vsel %vm727_vm5, %v1121_v17, %v1119_v28 }
 0x402   : > { %v1165_v21 = vpop.permute.xlu1 %1164  ;;  %v1124_v25 = vmul.f32 %v1122_v34, %v1868_v44  ;;  %v1125_v0 = vmul.f32 %v1123_v45, %v1871_v19  ;;  %v994_v44 = vmul.f32 %v993_v12, %v1885_v39  ;;  %v995_v19 = vmul.f32 %v992_v37, %v1892_v2 }
 0x404   : > { %v1174_v43 = vadd.f32 %v1124_v25, %v1078_v32  ;;  %v1175_v62 = vadd.f32 %v1125_v0, %v1079_v61  ;;  %v1172_v38 = vadd.f32 %v1040_v26, %v994_v44  ;;  %v1173_v35 = vadd.f32 %v1041_v16, %v995_v19 }
 0x406   : > { %v1167_v15 = vpop.permute.xlu1 %1166  ;;  %v1176_v46 = vadd.f32 %v1174_v43, %v1172_v38  ;;  %v1177_v3 = vadd.f32 %v1175_v62, %v1173_v35 }
 0x407   : > { %v1168_v51 = vsel %vm782_vm8, %v1165_v21, %v1167_v15  ;;  %v1169_v41 = vsel %vm782_vm8, %v1167_v15, %v1165_v21 }
 0x408   : > { %v1170_v40 = vmul.f32 %v1168_v51, %v1904_v33  ;;  %v1171_v29 = vmul.f32 %v1169_v41, %v1907_v27 }
 0x40d   : > { %v1181_v7 = vpop.permute.xlu0 %1180 }
 0x40e   : > { %v1183_v13 = vadd.f32 %v1181_v7, %v1170_v40  ;;  %v1184_v30 = vadd.f32 %v1181_v7, %v1171_v29 }
 0x410   : > { %v1185_v4 = vadd.f32 %v1183_v13, %v1176_v46  ;;  %v1186_v9 = vadd.f32 %v1184_v30, %v1177_v3 }
 0x412   : > { %v1189_v39 = vadd.f32 %v1185_v4, %v1505_v6  ;;  %v1190_v2 = vadd.f32 %v1186_v9, %v1503_v5 }
 0x414   : > { %1193 = vst [vmem:[%s1931_s29 + $0x10] sm:$0xff] %v1189_v39  ;;  %1194 = vst [vmem:[%s1931_s29 + $0x18] sm:$0xff] %v1190_v2 }
 0x415 PF: > { %s20_s13 = sadd.s32 1, %s1385_s13  }
 0x416   : > { %p17_p4 = scmp.ge.s32.totalorder %s20_s13, 4  }
 0x418   :  { %19 = sbr.rel (!%p17_p4) target bundleno = 1 (0x1), region = 90 }

</bundles_post_ra>
